<compile_context>
chip_gen: v7x
topology: tpu7x:2x2x1
jax: 0.10.0
libtpu: 0.0.40
codegen_flags: <defaults>
</compile_context>

<pallas_src>
import jax
import jax.numpy as jnp
from jax.experimental import pallas as pl
from jax.experimental.pallas import tpu as pltpu


def _make_kernel(D, H):
    DH = D * H
    P = ((H + 1 + 7) // 8) * 8      # sublane-aligned zero-pad row count (>= H+1)

    def kernel(x_ref, w1_ref, b1_ref, w2_ref, b2_ref, o_ref):
        x = x_ref[0]                                          # (DH, WC), lane-dense
        WC = x.shape[1]

        # y-boundary masks for SAME padding along H (shared by both convs).
        yi = jax.lax.broadcasted_iota(jnp.int32, (DH, 1), 0) % H
        mask_up = yi >= 1                # rows whose (y-1) is in range
        mask_dn = yi <= H - 2            # rows whose (y+1) is in range
        zpad = jnp.zeros((P, WC), jnp.float32)

        def conv3x3x3(x2d, w_banded, bias_row):
            # x2d: (DH, WC); w_banded: (9*WC, WC); bias_row: (1, WC)
            xpad = jnp.concatenate([zpad, x2d, zpad], axis=0)   # (2P + DH, WC)
            taps = []
            for dz in (-1, 0, 1):
                for dy in (-1, 0, 1):
                    start = P + dz * H + dy
                    t = xpad[start:start + DH, :]
                    # zero rows whose y + dy falls outside [0, H)
                    if dy == -1:
                        t = jnp.where(mask_up, t, 0.0)
                    elif dy == 1:
                        t = jnp.where(mask_dn, t, 0.0)
                    taps.append(t)
            im2col = jnp.concatenate(taps, axis=1)              # (DH, 9*WC)
            out = jnp.dot(im2col, w_banded, preferred_element_type=jnp.float32)
            return out + bias_row

        h1 = jnp.maximum(conv3x3x3(x, w1_ref[...], b1_ref[...]), 0.0)
        h2 = conv3x3x3(h1, w2_ref[...], b2_ref[...])
        o_ref[0] = jnp.maximum(h2 + x, 0.0)                     # identity residual + ReLU

    return kernel


def _banded_weight(w_oidhw, W):
    """PyTorch Conv3d weight (Cout, Cin, 3, 3, 3) -> (9*W*Cin, W*Cout).

    Row index = ((kz*3 + ky)*W + w_in)*Cin + ci, col index = w_out*Cout + co.
    The band structure (|w_in - w_out| <= 1) encodes the kw taps and the SAME
    zero padding along W."""
    Cout, Cin = w_oidhw.shape[0], w_oidhw.shape[1]
    wk = jnp.transpose(w_oidhw, (2, 3, 4, 1, 0))   # (kz, ky, kw, Cin, Cout)
    B = jnp.zeros((3, 3, W, Cin, W, Cout), w_oidhw.dtype)
    for kw in range(3):
        dw = kw - 1
        for wout in range(W):
            win = wout + dw
            if 0 <= win < W:
                B = B.at[:, :, win, :, wout, :].set(wk[:, :, kw])
    return B.reshape(9 * W * Cin, W * Cout)


def basic_block3d_pallas(x, w1, b1, w2, b2):
    """x: (N, C, D, H, W) f32; w*: (C, C, 3, 3, 3) PyTorch Conv3d layout; b*: (C,)."""
    N, C, D, H, W = x.shape
    DH, WC = D * H, W * C

    x_dense = jnp.transpose(x, (0, 2, 3, 4, 1)).reshape(N, DH, WC)
    w1b = _banded_weight(w1, W)                 # (9*WC, WC) = (1152, 128)
    w2b = _banded_weight(w2, W)
    b1r = jnp.tile(b1, W).reshape(1, WC)
    b2r = jnp.tile(b2, W).reshape(1, WC)

    out_dense = pl.pallas_call(
        _make_kernel(D, H),
        out_shape=jax.ShapeDtypeStruct((N, DH, WC), jnp.float32),
        grid_spec=pltpu.PrefetchScalarGridSpec(
            num_scalar_prefetch=0,
            grid=(N,),
            in_specs=[
                pl.BlockSpec((1, DH, WC), lambda b: (b, 0, 0)),
                pl.BlockSpec((9 * WC, WC), lambda b: (0, 0)),
                pl.BlockSpec((1, WC), lambda b: (0, 0)),
                pl.BlockSpec((9 * WC, WC), lambda b: (0, 0)),
                pl.BlockSpec((1, WC), lambda b: (0, 0)),
            ],
            out_specs=pl.BlockSpec((1, DH, WC), lambda b: (b, 0, 0)),
        ),
        compiler_params=pltpu.CompilerParams(
            dimension_semantics=("parallel",)),
    )(x_dense, w1b, b1r, w2b, b2r)

    return jnp.transpose(out_dense.reshape(N, D, H, W, C), (0, 4, 1, 2, 3))


def basic_block3d_reference(x, w1, b1, w2, b2):
    """Pure-JAX reference (lax.conv) mirroring the PyTorch forward."""
    dn = ("NCDHW", "OIDHW", "NCDHW")
    prec = jax.lax.Precision.HIGHEST
    h1 = jax.lax.conv_general_dilated(x, w1, (1, 1, 1), "SAME",
                                      dimension_numbers=dn, precision=prec)
    h1 = jnp.maximum(h1 + b1.reshape(1, -1, 1, 1, 1), 0.0)
    h2 = jax.lax.conv_general_dilated(h1, w2, (1, 1, 1), "SAME",
                                      dimension_numbers=dn, precision=prec)
    h2 = h2 + b2.reshape(1, -1, 1, 1, 1)
    return jnp.maximum(h2 + x, 0.0)


if __name__ == "__main__":
    # Small shapes consistent with the module: identity residual requires
    # inplanes == planes; batch=2, channels=8, spatial D,H,W = 8,8,16
    # (W*C = 128 -> lane-dense kernel layout).
    N, C, D, H, W = 2, 8, 8, 8, 16

    key = jax.random.PRNGKey(0)
    kx, kw1, kb1, kw2, kb2 = jax.random.split(key, 5)

    x = jax.random.normal(kx, (N, C, D, H, W), jnp.float32)
    w1 = 0.1 * jax.random.normal(kw1, (C, C, 3, 3, 3), jnp.float32)
    b1 = 0.1 * jax.random.normal(kb1, (C,), jnp.float32)
    w2 = 0.1 * jax.random.normal(kw2, (C, C, 3, 3, 3), jnp.float32)
    b2 = 0.1 * jax.random.normal(kb2, (C,), jnp.float32)

    out = jax.block_until_ready(basic_block3d_pallas(x, w1, b1, w2, b2))
    ref = jax.block_until_ready(basic_block3d_reference(x, w1, b1, w2, b2))

    assert out.shape == (N, C, D, H, W), out.shape
    assert jnp.allclose(out, ref, atol=1e-4, rtol=1e-4), \
        float(jnp.max(jnp.abs(out - ref)))

    print("KERNEL_OK")
</pallas_src>

<mosaic_0001>
module attributes {stable_mosaic.version = 11 : i64} {
  func.func @kernel(%arg0: i32, %arg1: memref<1x64x128xf32, #tpu.memory_space<vmem>>, %arg2: memref<1152x128xf32, #tpu.memory_space<vmem>>, %arg3: memref<1x128xf32, #tpu.memory_space<vmem>>, %arg4: memref<1152x128xf32, #tpu.memory_space<vmem>>, %arg5: memref<1x128xf32, #tpu.memory_space<vmem>>, %arg6: memref<1x64x128xf32, #tpu.memory_space<vmem>>) attributes {dimension_semantics = [#tpu.dimension_semantics<parallel>], iteration_bounds = array<i64: 2>, scalar_prefetch = 0 : i64, scratch_operands = 0 : i64, tpu.core_type = #tpu.core_type<tc>, window_params = [{transform_indices = @transform_0, window_bounds = array<i64: 1, 64, 128>}, {pipeline_mode = #tpu.pipeline_mode<synchronous>, transform_indices = @transform_1, window_bounds = array<i64: 1152, 128>}, {pipeline_mode = #tpu.pipeline_mode<synchronous>, transform_indices = @transform_2, window_bounds = array<i64: 1, 128>}, {pipeline_mode = #tpu.pipeline_mode<synchronous>, transform_indices = @transform_3, window_bounds = array<i64: 1152, 128>}, {pipeline_mode = #tpu.pipeline_mode<synchronous>, transform_indices = @transform_4, window_bounds = array<i64: 1, 128>}, {transform_indices = @transform_5, window_bounds = array<i64: 1, 64, 128>}]} {
    %c0 = arith.constant 0 : index
    %c0_0 = arith.constant 0 : index
    %c0_1 = arith.constant 0 : index
    %0 = vector.load %arg1[%c0, %c0_0, %c0_1] : memref<1x64x128xf32, #tpu.memory_space<vmem>>, vector<1x64x128xf32>
    %1 = vector.shape_cast %0 : vector<1x64x128xf32> to vector<64x128xf32>
    %2 = tpu.iota {dimensions = array<i32: 0>} : vector<64x1xi32>
    %c8_i32 = arith.constant 8 : i32
    %c0_i32 = arith.constant 0 : i32
    %3 = arith.cmpi eq, %c8_i32, %c0_i32 : i32
    %c1_i32 = arith.constant 1 : i32
    %4 = arith.select %3, %c1_i32, %c8_i32 : i32
    %5 = vector.broadcast %4 : i32 to vector<64x1xi32>
    %6 = arith.remsi %2, %5 : vector<64x1xi32>
    %c0_i32_2 = arith.constant 0 : i32
    %7 = vector.broadcast %c0_i32_2 : i32 to vector<64x1xi32>
    %8 = arith.cmpi ne, %6, %7 : vector<64x1xi32>
    %c0_i32_3 = arith.constant 0 : i32
    %9 = vector.broadcast %c0_i32_3 : i32 to vector<64x1xi32>
    %10 = arith.cmpi slt, %6, %9 : vector<64x1xi32>
    %c0_i32_4 = arith.constant 0 : i32
    %11 = arith.cmpi slt, %4, %c0_i32_4 : i32
    %12 = vector.broadcast %11 : i1 to vector<64x1xi1>
    %13 = vector.broadcast %12 : vector<64x1xi1> to vector<64x1xi1>
    %14 = arith.xori %10, %13 : vector<64x1xi1>
    %15 = arith.andi %14, %8 : vector<64x1xi1>
    %16 = vector.broadcast %4 : i32 to vector<64x1xi32>
    %17 = arith.addi %6, %16 : vector<64x1xi32>
    %18 = arith.select %15, %17, %6 : vector<64x1xi1>, vector<64x1xi32>
    %c1_i32_5 = arith.constant 1 : i32
    %19 = vector.broadcast %c1_i32_5 : i32 to vector<64x1xi32>
    %20 = arith.cmpi sge, %18, %19 : vector<64x1xi32>
    %c6_i32 = arith.constant 6 : i32
    %21 = vector.broadcast %c6_i32 : i32 to vector<64x1xi32>
    %22 = arith.cmpi sle, %18, %21 : vector<64x1xi32>
    %cst = arith.constant 0.000000e+00 : f32
    %23 = vector.broadcast %cst : f32 to vector<16x128xf32>
    %c0_6 = arith.constant 0 : index
    %c0_7 = arith.constant 0 : index
    %24 = vector.load %arg2[%c0_6, %c0_7] : memref<1152x128xf32, #tpu.memory_space<vmem>>, vector<1152x128xf32>
    %c0_8 = arith.constant 0 : index
    %c0_9 = arith.constant 0 : index
    %25 = vector.load %arg3[%c0_8, %c0_9] : memref<1x128xf32, #tpu.memory_space<vmem>>, vector<1x128xf32>
    %26 = tpu.concatenate %23, %1, %23 in 0 : vector<16x128xf32>, vector<64x128xf32>, vector<16x128xf32> -> vector<96x128xf32>
    %27 = vector.extract_strided_slice %26 {offsets = [7, 0], sizes = [64, 128], strides = [1, 1]} : vector<96x128xf32> to vector<64x128xf32>
    %cst_10 = arith.constant 0.000000e+00 : f32
    %28 = vector.shape_cast %20 : vector<64x1xi1> to vector<64x1xi1>
    %29 = vector.broadcast %28 : vector<64x1xi1> to vector<64x128xi1>
    %30 = vector.broadcast %cst_10 : f32 to vector<64x128xf32>
    %31 = arith.select %29, %27, %30 : vector<64x128xi1>, vector<64x128xf32>
    %32 = vector.extract_strided_slice %26 {offsets = [8, 0], sizes = [64, 128], strides = [1, 1]} : vector<96x128xf32> to vector<64x128xf32>
    %33 = vector.extract_strided_slice %26 {offsets = [9, 0], sizes = [64, 128], strides = [1, 1]} : vector<96x128xf32> to vector<64x128xf32>
    %cst_11 = arith.constant 0.000000e+00 : f32
    %34 = vector.shape_cast %22 : vector<64x1xi1> to vector<64x1xi1>
    %35 = vector.broadcast %34 : vector<64x1xi1> to vector<64x128xi1>
    %36 = vector.broadcast %cst_11 : f32 to vector<64x128xf32>
    %37 = arith.select %35, %33, %36 : vector<64x128xi1>, vector<64x128xf32>
    %38 = vector.extract_strided_slice %26 {offsets = [15, 0], sizes = [64, 128], strides = [1, 1]} : vector<96x128xf32> to vector<64x128xf32>
    %cst_12 = arith.constant 0.000000e+00 : f32
    %39 = vector.shape_cast %20 : vector<64x1xi1> to vector<64x1xi1>
    %40 = vector.broadcast %39 : vector<64x1xi1> to vector<64x128xi1>
    %41 = vector.broadcast %cst_12 : f32 to vector<64x128xf32>
    %42 = arith.select %40, %38, %41 : vector<64x128xi1>, vector<64x128xf32>
    %43 = vector.extract_strided_slice %26 {offsets = [16, 0], sizes = [64, 128], strides = [1, 1]} : vector<96x128xf32> to vector<64x128xf32>
    %44 = vector.extract_strided_slice %26 {offsets = [17, 0], sizes = [64, 128], strides = [1, 1]} : vector<96x128xf32> to vector<64x128xf32>
    %cst_13 = arith.constant 0.000000e+00 : f32
    %45 = vector.shape_cast %22 : vector<64x1xi1> to vector<64x1xi1>
    %46 = vector.broadcast %45 : vector<64x1xi1> to vector<64x128xi1>
    %47 = vector.broadcast %cst_13 : f32 to vector<64x128xf32>
    %48 = arith.select %46, %44, %47 : vector<64x128xi1>, vector<64x128xf32>
    %49 = vector.extract_strided_slice %26 {offsets = [23, 0], sizes = [64, 128], strides = [1, 1]} : vector<96x128xf32> to vector<64x128xf32>
    %cst_14 = arith.constant 0.000000e+00 : f32
    %50 = vector.shape_cast %20 : vector<64x1xi1> to vector<64x1xi1>
    %51 = vector.broadcast %50 : vector<64x1xi1> to vector<64x128xi1>
    %52 = vector.broadcast %cst_14 : f32 to vector<64x128xf32>
    %53 = arith.select %51, %49, %52 : vector<64x128xi1>, vector<64x128xf32>
    %54 = vector.extract_strided_slice %26 {offsets = [24, 0], sizes = [64, 128], strides = [1, 1]} : vector<96x128xf32> to vector<64x128xf32>
    %55 = vector.extract_strided_slice %26 {offsets = [25, 0], sizes = [64, 128], strides = [1, 1]} : vector<96x128xf32> to vector<64x128xf32>
    %cst_15 = arith.constant 0.000000e+00 : f32
    %56 = vector.shape_cast %22 : vector<64x1xi1> to vector<64x1xi1>
    %57 = vector.broadcast %56 : vector<64x1xi1> to vector<64x128xi1>
    %58 = vector.broadcast %cst_15 : f32 to vector<64x128xf32>
    %59 = arith.select %57, %55, %58 : vector<64x128xi1>, vector<64x128xf32>
    %60 = tpu.concatenate %31, %32, %37, %42, %43, %48, %53, %54, %59 in 1 : vector<64x128xf32>, vector<64x128xf32>, vector<64x128xf32>, vector<64x128xf32>, vector<64x128xf32>, vector<64x128xf32>, vector<64x128xf32>, vector<64x128xf32>, vector<64x128xf32> -> vector<64x1152xf32>
    %cst_16 = arith.constant dense<0.000000e+00> : vector<64x128xf32>
    %61 = tpu.matmul %60, %24, %cst_16 {dimension_numbers = #tpu.dot_dimension_numbers<[1], [0], [0], [1], [0, 0, 1, 1], [], []>} : vector<64x1152xf32>, vector<1152x128xf32>, vector<64x128xf32> -> vector<64x128xf32>
    %62 = vector.broadcast %25 : vector<1x128xf32> to vector<64x128xf32>
    %63 = arith.addf %61, %62 : vector<64x128xf32>
    %cst_17 = arith.constant 0.000000e+00 : f32
    %64 = vector.broadcast %cst_17 : f32 to vector<64x128xf32>
    %65 = arith.maximumf %63, %64 : vector<64x128xf32>
    %c0_18 = arith.constant 0 : index
    %c0_19 = arith.constant 0 : index
    %66 = vector.load %arg4[%c0_18, %c0_19] : memref<1152x128xf32, #tpu.memory_space<vmem>>, vector<1152x128xf32>
    %c0_20 = arith.constant 0 : index
    %c0_21 = arith.constant 0 : index
    %67 = vector.load %arg5[%c0_20, %c0_21] : memref<1x128xf32, #tpu.memory_space<vmem>>, vector<1x128xf32>
    %68 = tpu.concatenate %23, %65, %23 in 0 : vector<16x128xf32>, vector<64x128xf32>, vector<16x128xf32> -> vector<96x128xf32>
    %69 = vector.extract_strided_slice %68 {offsets = [7, 0], sizes = [64, 128], strides = [1, 1]} : vector<96x128xf32> to vector<64x128xf32>
    %cst_22 = arith.constant 0.000000e+00 : f32
    %70 = vector.shape_cast %20 : vector<64x1xi1> to vector<64x1xi1>
    %71 = vector.broadcast %70 : vector<64x1xi1> to vector<64x128xi1>
    %72 = vector.broadcast %cst_22 : f32 to vector<64x128xf32>
    %73 = arith.select %71, %69, %72 : vector<64x128xi1>, vector<64x128xf32>
    %74 = vector.extract_strided_slice %68 {offsets = [8, 0], sizes = [64, 128], strides = [1, 1]} : vector<96x128xf32> to vector<64x128xf32>
    %75 = vector.extract_strided_slice %68 {offsets = [9, 0], sizes = [64, 128], strides = [1, 1]} : vector<96x128xf32> to vector<64x128xf32>
    %cst_23 = arith.constant 0.000000e+00 : f32
    %76 = vector.shape_cast %22 : vector<64x1xi1> to vector<64x1xi1>
    %77 = vector.broadcast %76 : vector<64x1xi1> to vector<64x128xi1>
    %78 = vector.broadcast %cst_23 : f32 to vector<64x128xf32>
    %79 = arith.select %77, %75, %78 : vector<64x128xi1>, vector<64x128xf32>
    %80 = vector.extract_strided_slice %68 {offsets = [15, 0], sizes = [64, 128], strides = [1, 1]} : vector<96x128xf32> to vector<64x128xf32>
    %cst_24 = arith.constant 0.000000e+00 : f32
    %81 = vector.shape_cast %20 : vector<64x1xi1> to vector<64x1xi1>
    %82 = vector.broadcast %81 : vector<64x1xi1> to vector<64x128xi1>
    %83 = vector.broadcast %cst_24 : f32 to vector<64x128xf32>
    %84 = arith.select %82, %80, %83 : vector<64x128xi1>, vector<64x128xf32>
    %85 = vector.extract_strided_slice %68 {offsets = [16, 0], sizes = [64, 128], strides = [1, 1]} : vector<96x128xf32> to vector<64x128xf32>
    %86 = vector.extract_strided_slice %68 {offsets = [17, 0], sizes = [64, 128], strides = [1, 1]} : vector<96x128xf32> to vector<64x128xf32>
    %cst_25 = arith.constant 0.000000e+00 : f32
    %87 = vector.shape_cast %22 : vector<64x1xi1> to vector<64x1xi1>
    %88 = vector.broadcast %87 : vector<64x1xi1> to vector<64x128xi1>
    %89 = vector.broadcast %cst_25 : f32 to vector<64x128xf32>
    %90 = arith.select %88, %86, %89 : vector<64x128xi1>, vector<64x128xf32>
    %91 = vector.extract_strided_slice %68 {offsets = [23, 0], sizes = [64, 128], strides = [1, 1]} : vector<96x128xf32> to vector<64x128xf32>
    %cst_26 = arith.constant 0.000000e+00 : f32
    %92 = vector.shape_cast %20 : vector<64x1xi1> to vector<64x1xi1>
    %93 = vector.broadcast %92 : vector<64x1xi1> to vector<64x128xi1>
    %94 = vector.broadcast %cst_26 : f32 to vector<64x128xf32>
    %95 = arith.select %93, %91, %94 : vector<64x128xi1>, vector<64x128xf32>
    %96 = vector.extract_strided_slice %68 {offsets = [24, 0], sizes = [64, 128], strides = [1, 1]} : vector<96x128xf32> to vector<64x128xf32>
    %97 = vector.extract_strided_slice %68 {offsets = [25, 0], sizes = [64, 128], strides = [1, 1]} : vector<96x128xf32> to vector<64x128xf32>
    %cst_27 = arith.constant 0.000000e+00 : f32
    %98 = vector.shape_cast %22 : vector<64x1xi1> to vector<64x1xi1>
    %99 = vector.broadcast %98 : vector<64x1xi1> to vector<64x128xi1>
    %100 = vector.broadcast %cst_27 : f32 to vector<64x128xf32>
    %101 = arith.select %99, %97, %100 : vector<64x128xi1>, vector<64x128xf32>
    %102 = tpu.concatenate %73, %74, %79, %84, %85, %90, %95, %96, %101 in 1 : vector<64x128xf32>, vector<64x128xf32>, vector<64x128xf32>, vector<64x128xf32>, vector<64x128xf32>, vector<64x128xf32>, vector<64x128xf32>, vector<64x128xf32>, vector<64x128xf32> -> vector<64x1152xf32>
    %cst_28 = arith.constant dense<0.000000e+00> : vector<64x128xf32>
    %103 = tpu.matmul %102, %66, %cst_28 {dimension_numbers = #tpu.dot_dimension_numbers<[1], [0], [0], [1], [0, 0, 1, 1], [], []>} : vector<64x1152xf32>, vector<1152x128xf32>, vector<64x128xf32> -> vector<64x128xf32>
    %104 = vector.broadcast %67 : vector<1x128xf32> to vector<64x128xf32>
    %105 = arith.addf %103, %104 : vector<64x128xf32>
    %106 = arith.addf %105, %1 : vector<64x128xf32>
    %cst_29 = arith.constant 0.000000e+00 : f32
    %107 = vector.broadcast %cst_29 : f32 to vector<64x128xf32>
    %108 = arith.maximumf %106, %107 : vector<64x128xf32>
    %c0_30 = arith.constant 0 : index
    %c0_31 = arith.constant 0 : index
    %c0_32 = arith.constant 0 : index
    %109 = vector.load %arg6[%c0_30, %c0_31, %c0_32] : memref<1x64x128xf32, #tpu.memory_space<vmem>>, vector<1x64x128xf32>
    %110 = vector.shape_cast %109 : vector<1x64x128xf32> to vector<64x128xf32>
    %111 = vector.shape_cast %108 : vector<64x128xf32> to vector<1x64x128xf32>
    tpu.vector_store %arg6[%c0_30, %c0_31, %c0_32], %111 {strides = array<i32>} : memref<1x64x128xf32, #tpu.memory_space<vmem>>, vector<1x64x128xf32>,
    return
  }
  func.func @transform_0(%arg0: i32) -> (i32, i32, i32) {
    %c0_i32 = arith.constant 0 : i32
    %c0_i32_0 = arith.constant 0 : i32
    %c0_i32_1 = arith.constant 0 : i32
    return %arg0, %c0_i32, %c0_i32_0 : i32, i32, i32
  }
  func.func @transform_1(%arg0: i32) -> (i32, i32) {
    %c0_i32 = arith.constant 0 : i32
    %c0_i32_0 = arith.constant 0 : i32
    %c0_i32_1 = arith.constant 0 : i32
    return %c0_i32, %c0_i32_0 : i32, i32
  }
  func.func @transform_2(%arg0: i32) -> (i32, i32) {
    %c0_i32 = arith.constant 0 : i32
    %c0_i32_0 = arith.constant 0 : i32
    %c0_i32_1 = arith.constant 0 : i32
    return %c0_i32, %c0_i32_0 : i32, i32
  }
  func.func @transform_3(%arg0: i32) -> (i32, i32) {
    %c0_i32 = arith.constant 0 : i32
    %c0_i32_0 = arith.constant 0 : i32
    %c0_i32_1 = arith.constant 0 : i32
    return %c0_i32, %c0_i32_0 : i32, i32
  }
  func.func @transform_4(%arg0: i32) -> (i32, i32) {
    %c0_i32 = arith.constant 0 : i32
    %c0_i32_0 = arith.constant 0 : i32
    %c0_i32_1 = arith.constant 0 : i32
    return %c0_i32, %c0_i32_0 : i32, i32
  }
  func.func @transform_5(%arg0: i32) -> (i32, i32, i32) {
    %c0_i32 = arith.constant 0 : i32
    %c0_i32_0 = arith.constant 0 : i32
    %c0_i32_1 = arith.constant 0 : i32
    return %arg0, %c0_i32, %c0_i32_0 : i32, i32, i32
  }
}

</mosaic_0001>

<bundles_post_ra>
// kernel: tpu_custom_call.1
= control target key start
LH: loop header
LB: loop body
LE: loop exit
PB: predicated region body
PF: predicated region fallthrough
CT: control target
= control target key end

     0   :  { %10 = vsyncpa [#allocation3], 0  ;;  %s4348_s0 = inlined_call_operand.hbm [shape: f32[2,64,128], index: 0, kind: input, shape index: {}]   ;;  %s4349_s1 = inlined_call_operand.hbm [shape: f32[1152,128], index: 1, kind: input, shape index: {}]   ;;  %s4350_s2 = inlined_call_operand.vmem [shape: f32[1,128], index: 2, kind: input, shape index: {}]   ;;  %s4351_s3 = inlined_call_operand.hbm [shape: f32[1152,128], index: 3, kind: input, shape index: {}]   ;;  %s4352_s4 = inlined_call_operand.vmem [shape: f32[1,128], index: 4, kind: input, shape index: {}]   ;;  %s4353_s5 = inlined_call_operand.hbm [shape: f32[2,64,128], index: 5, kind: output, shape index: {}]  }
   0x1   :  { %12 = vsyncpa [#allocation3 + $0x1], 0 }
   0x2   :  { %13 = vsyncpa [#allocation6], 0 }
   0x3   :  { %14 = vsyncpa [#allocation4], 0 }
   0x4   :  { %16 = vsyncpa [#allocation4 + $0x1], 0  ;;  %s3445_s18 = smov 0   ;;  %s3447_s19 = smov 0  }
   0x5   :  { %s3449_s20 = smov 0   ;;  %s3451_s21 = smov 0  }
   0x6 LB: > { %s3466_s22 = sadd.s32 4294967295, %s3404_s21   ;;  %s2146_s23 = sadd.s32 4294967294, %s3404_s21   ;;  %s3404_s21 = sphi %s3451_s21, %s4436_s21   ;;  %s3400_s20 = sphi %s3449_s20, %s4435_s20   ;;  %s3396_s19 = sphi %s3447_s19, %s4434_s19   ;;  %s3392_s18 = sphi %s3445_s18, %s4433_s18  }
   0x7   : > { %p42_p0 = scmp.ne.s32.totalorder %s3396_s19, %s3392_s18  ;;  %p4354_p1 = scmp.eq.s32.totalorder %s3466_s22, 0 }
   0x8   : > { %p156_p3 = scmp.eq.s32.totalorder %s2146_s23, 1  ;;  %p2147_p5 = scmp.ge.s32.totalorder %s3404_s21, 1 }
   0x9   : > { %p3475_p4 = por %p4354_p1, %p42_p0  ;;  %p163_p7 = scmp.lt.s32.totalorder %s3404_s21, 3 }
   0xa   : > { %p3480_p6 = por %p156_p3, %p42_p0  ;;  %s3406_s27 = smov [#allocation5]  }
   0xb   : > { %s4370_s24 = scalar_select %p3475_p4, 1, 0 }
   0xc   : > { %s4371_s25 = scalar_select %p3480_p6, 1, 0 }
   0xd   : > { %p3485_p8 = pnand %p2147_p5, %p163_p7  ;;  %s175_s28 = sshll.u32 %s3406_s27, 4  ;;  %s3489_s28 = int_to_ptr.vmem [resolvable:$true] %s175_s28 }
   0xe   : > { %s3407_s30 = smov [#allocation7]   ;;  %s3248_s9 = scalar_lea.hbm %s4349_s1, 18432 }
   0xf   : > { %p3180_p9 = pneg %p3485_p8  ;;  %s191_s6 = sshll.u32 %s3407_s30, 4  ;;  %s3500_s6 = int_to_ptr.vmem [resolvable:$true] %s191_s6 }
  0x10   : > { %p3249_p12 = scmp.ne.s32.totalorder %s4349_s1, %s3248_s9  ;;  %p3255_p5 = scmp.lt.u32.totalorder %s3248_s9, %s4349_s1 }
  0x11   : > { %p3496_p11 = pnand %p3180_p9, %p4354_p1 }
  0x13   : > { %p3250_p13 = pneg %p3496_p11 }
  0x15   : > { %p3251_p0 = pnand %p3250_p13, %p3249_p12 }
  0x17   : > { %p3252_p3 = pneg %p3251_p0 }
  0x19   : > { %p3257_p7 = pnand %p3255_p5, %p3252_p3 }
  0x1b   : > { %3260 = shalt.err (!%p3257_p7)
}
  0x1c   : > { %s3261_s14 = scalar_lea.vmem %s3489_s28, 18432  ;;  %p3269_p2 = scmp.lt.s32.totalorder %s3489_s28, %s3489_s28 }
  0x1d   : > { %p3262_p9 = scmp.ne.s32.totalorder %s3489_s28, %s3261_s14  ;;  %p3270_p12 = scmp.lt.s32.totalorder %s3261_s14, %s3261_s14 }
  0x1f   : > { %p3264_p10 = pnand %p3262_p9, %p3250_p13  ;;  %p3271_p0 = por %p3270_p12, %p3269_p2 }
  0x21   : > { %p3265_p1 = pneg %p3264_p10 }
  0x23   : > { %p3272_p6 = pnand %p3271_p0, %p3265_p1 }
  0x25   : > { %3275 = shalt.err (!%p3272_p6)
}
  0x26   : > { %s3408_s15 = smov 128   ;;  %s3409_s16 = smov 8  }
  0x27   : > { %3183 = dma.hbm_to_vmem [thread:$0]  (!%p3496_p11), %s4349_s1, 18432, %s3489_s28, [#allocation6], %s3408_s15, %s3408_s15, %s3409_s16  }
  0x28   : > { %s3276_s7 = scalar_lea.hbm %s4351_s3, 18432 }
  0x29   : > { %p3277_p1 = scmp.ne.s32.totalorder %s4351_s3, %s3276_s7  ;;  %p3283_p10 = scmp.lt.u32.totalorder %s3276_s7, %s4351_s3 }
  0x2b   : > { %p3279_p2 = pnand %p3277_p1, %p3250_p13 }
  0x2d   : > { %p3280_p6 = pneg %p3279_p2 }
  0x2f   : > { %p3285_p3 = pnand %p3283_p10, %p3280_p6 }
  0x31   : > { %3288 = shalt.err (!%p3285_p3)
}
  0x32   : > { %s3289_s28 = scalar_lea.vmem %s3500_s6, 18432  ;;  %p3297_p12 = scmp.lt.s32.totalorder %s3500_s6, %s3500_s6 }
  0x33   : > { %p3290_p5 = scmp.ne.s32.totalorder %s3500_s6, %s3289_s28  ;;  %p3298_p0 = scmp.lt.s32.totalorder %s3289_s28, %s3289_s28 }
  0x35   : > { %p3292_p7 = pnand %p3290_p5, %p3250_p13  ;;  %p3299_p1 = por %p3298_p0, %p3297_p12 }
  0x37   : > { %p3293_p9 = pneg %p3292_p7 }
  0x39   : > { %p3300_p2 = pnand %p3299_p1, %p3293_p9 }
  0x3b   : > { %3303 = shalt.err (!%p3300_p2)
}
  0x3c   : > { %3186 = dma.hbm_to_vmem [thread:$0]  (!%p3496_p11), %s4351_s3, 18432, %s3500_s6, [#allocation6], %s3408_s15, %s3408_s15, %s3409_s16  }
  0x3d   : > { %s3561_s29 = sadd.s32 1, %s3404_s21   ;;  %s29_s14 = sadd.s32 1, %s3400_s20 }
  0x3e   : > { %s26_s17 = ssub.s32 %s3404_s21, %s3561_s29  ;;  %p36_p13 = scmp.ne.s32.totalorder %s3400_s20, %s3396_s19 }
  0x3f   : > { %p27_p6 = scmp.eq.s32.totalorder %s26_s17, 0  ;;  %p37_p10 = scmp.eq.s32.totalorder %s3404_s21, 0 }
  0x40   : > { %p4374_p3 = scmp.eq.s32.totalorder %s3466_s22, 1  ;;  %p3197_p7 = scmp.lt.s32.totalorder %s3404_s21, 2 }
  0x41   : > { %s3577_s27 = scalar_select %p27_p6, %s3400_s20, %s29_s14  }
  0x42   : > { %p3571_p5 = por %p4374_p3, %p36_p13  ;;  %p38_p9 = por %p37_p10, %p36_p13 }
  0x43   : > { %s208_s30 = sand.u32 1, %s3400_s20   ;;  %s2262_s6 = sshll.u32 %s3404_s21, 10 }
  0x44   : > { %s4375_s23 = scalar_select %p3571_p5, 1, 0 }
  0x45   : > { %s2151_s7 = sshll.u32 %s208_s30, 6  ;;  %s3584_s10 = scalar_lea.hbm %s4348_s0, %s2262_s6 }
  0x46   : > { %s212_s11 = scalar_lea.vmem [#allocation2], %s2151_s7  ;;  %p3588_p11 = pnand %p3197_p7, %p38_p9 }
  0x47   : > { %s219_s28 = sshll.u32 %s212_s11, 4  ;;  %s3592_s13 = scalar_lea.sflag [#allocation3], %s208_s30  ;;  %s3586_s28 = int_to_ptr.vmem [resolvable:$true] %s219_s28 }
  0x48   : > { %s3304_s14 = scalar_lea.hbm %s3584_s10, 1024  ;;  %p3306_p0 = pneg %p3588_p11 }
  0x49   : > { %p3305_p12 = scmp.ne.s32.totalorder %s3584_s10, %s3304_s14  ;;  %s3309_s6 = scalar_lea.hbm %s4348_s0, 2048 }
  0x4a   : > { %p3310_p13 = scmp.lt.u32.totalorder %s3584_s10, %s4348_s0  ;;  %p3311_p6 = scmp.lt.u32.totalorder %s3309_s6, %s3304_s14 }
  0x4b   : > { %p3307_p1 = pnand %p3306_p0, %p3305_p12  ;;  %p3313_p3 = scmp.lt.u32.totalorder %s3304_s14, %s3584_s10 }
  0x4c   : > { %p3312_p10 = por %p3311_p6, %p3310_p13 }
  0x4d   : > { %p3308_p2 = pneg %p3307_p1 }
  0x4e   : > { %p3314_p7 = por %p3313_p3, %p3312_p10 }
  0x50   : > { %p3315_p9 = pnand %p3314_p7, %p3308_p2 }
  0x52   : > { %3318 = shalt.err (!%p3315_p9)
}
  0x53   : > { %s3319_s30 = scalar_lea.vmem %s3586_s28, 1024  ;;  %s3410_s11 = smov [#allocation2]  }
  0x54   : > { %p3320_p12 = scmp.ne.s32.totalorder %s3586_s28, %s3319_s30  ;;  %s3324_s17 = sshll.u32 %s3410_s11, 4  ;;  %s3325_s17 = int_to_ptr.vmem [resolvable:$false] %s3324_s17 }
  0x55   : > { %s3326_s7 = scalar_lea.vmem %s3325_s17, 2048  ;;  %p3327_p4 = scmp.lt.s32.totalorder %s3586_s28, %s3325_s17 }
  0x56   : > { %p3322_p1 = pnand %p3320_p12, %p3306_p0  ;;  %p3328_p13 = scmp.lt.s32.totalorder %s3326_s7, %s3319_s30 }
  0x58   : > { %p3323_p5 = pneg %p3322_p1  ;;  %p3329_p6 = por %p3328_p13, %p3327_p4 }
  0x5a   : > { %p3330_p10 = pnand %p3329_p6, %p3323_p5 }
  0x5c   : > { %3333 = shalt.err (!%p3330_p10)
}
  0x5d   : > { %3190 = dma.hbm_to_vmem [thread:$0]  (!%p3588_p11), %s3584_s10, 1024, %s3586_s28, %s3592_s13, %s3408_s15, %s3408_s15, %s3409_s16  }
  0x5e   : > { %231 = sbr.rel (%p3485_p8) target bundleno = 731 (0x2db), region = 40  ;;  %s3626_s14 = sand.u32 (!%p3485_p8), 1, %s3396_s19  }
  0x5f   : > { %s2155_s6 = sshll.u32 (!%p3485_p8), %s3626_s14, 6  ;;  %s234_s8 = scalar_lea.sflag (!%p3485_p8), [#allocation3], %s3626_s14 }
  0x60   : > { %s3632_s12 = scalar_lea.vmem (!%p3485_p8), [#allocation2], %s2155_s6  ;;  %p4377_p4 = scmp.ne.s32.totalorder (!%p3485_p8), %s4370_s24, 0 }
  0x65   : > { %3379 = dma.done.wait (%p4377_p4), %s234_s8, 1024  }
  0x66   : > { %3381 = vsyncadd (%p4377_p4), %s234_s8, 4294966272  ;;  %p4378_p5 = scmp.eq.s32.totalorder %s3466_s22, 0 }
  0x68   : > { %3383 = dma.done.wait (%p4378_p5), [#allocation6], 36864   ;;  %p4379_p8 = pmov %p4378_p5 }
  0x69   : > { %v3411_v0 = vmov 0.0   ;;  %v417_v1 = vld [vmem:[#allocation5 + $0x80] sm:$0xff]  ;;  %v418_v2 = vld [vmem:[#allocation5 + $0x88] sm:$0xff]  ;;  %v419_v12 = vld [vmem:[#allocation5 + $0x90] sm:$0xff]  ;;  %v280_v49 = vlaneseq  ;;  %vm4360_vm0 = vcmask 1040384   ;;  %vm4357_vm2 = vcmask 1046528  }
  0x6a   : > { %3385 = vsyncadd (%p4379_p8), [#allocation6], 4294930432  ;;  %765 = vmatprep.mubr.f32.mxu0 %v3411_v0  ;;  %v401_v3 = vld [vmem:[#allocation5] sm:$0xff]  ;;  %v2848_v4 = vpack.c.bf16 %v418_v2, %v417_v1  ;;  %v402_v5 = vld [vmem:[#allocation5 + $0x8] sm:$0xff]  ;;  %s4281_s10 = scalar_lea.vmem [#allocation8], %s2155_s6  ;;  %s2263_s13 = sshll.u32 %s3466_s22, 10 }
  0x6b   : > { %v449_v6 = vld [vmem:[#allocation5 + $0x180] sm:$0xff]  ;;  %v450_v7 = vld [vmem:[#allocation5 + $0x188] sm:$0xff]  ;;  %v2850_v8 = vpack.c.bf16 %v402_v5, %v401_v3  ;;  %v420_v14 = vld [vmem:[#allocation5 + $0x98] sm:$0xff]  ;;  %v3643_v1 = vshrl.u32 %v280_v49, 7  ;;  %s2054_s28 = sshll.u32 %s4281_s10, 4  ;;  %s4302_s11 = scalar_lea.hbm %s4353_s5, %s2263_s13  ;;  %s4295_s28 = int_to_ptr.vmem [resolvable:$true] %s2054_s28 }
  0x6c   : > { %v2880_v9 = vpack.c.bf16 %v450_v7, %v449_v6  ;;  %v433_v10 = vld [vmem:[#allocation5 + $0x100] sm:$0xff]  ;;  %v434_v11 = vld [vmem:[#allocation5 + $0x108] sm:$0xff]  ;;  %2849 = vmatprep.subr.bf16.mxu0 %v2848_v4  ;;  %v403_v15 = vld [vmem:[#allocation5 + $0x10] sm:$0xff]  ;;  %v2852_v17 = vpack.c.bf16 %v420_v14, %v419_v12  ;;  %s2041_s22 = scalar_lea.sflag [#allocation4], %s3626_s14  ;;  %s3334_s17 = scalar_lea.vmem %s4295_s28, 1024 }
  0x6d   : > { %v2882_v13 = vpack.c.bf16 %v434_v11, %v433_v10  ;;  %v404_v16 = vld [vmem:[#allocation5 + $0x18] sm:$0xff]  ;;  %2851 = vmatpush3.bf16.msra.mxu0 %v2850_v8  ;;  %v451_v19 = vld [vmem:[#allocation5 + $0x190] sm:$0xff]  ;;  %v421_v24 = vld [vmem:[#allocation5 + $0xa0] sm:$0xff]  ;;  %v293_v14 = vand.u32 7, %v3643_v1  ;;  %p3335_p11 = scmp.ne.s32.totalorder %s4295_s28, %s3334_s17  ;;  %p4430_p0 = scmp.ne.s32.totalorder %s4375_s23, 0 }
  0x6e   : > { %2881 = vmatprep.subr.bf16.mxu1 %v2880_v9  ;;  %v2854_v18 = vpack.c.bf16 %v404_v16, %v403_v15  ;;  %v452_v20 = vld [vmem:[#allocation5 + $0x198] sm:$0xff]  ;;  %v435_v21 = vld [vmem:[#allocation5 + $0x110] sm:$0xff]  ;;  %v422_v25 = vld [vmem:[#allocation5 + $0xa8] sm:$0xff]  ;;  %2853 = vmatprep.subr.bf16.mxu0 %v2852_v17  ;;  %s3412_s7 = smov [#allocation8]  }
  0x6f   : > { %2883 = vmatpush3.bf16.msra.mxu1 %v2882_v13  ;;  %v2884_v22 = vpack.c.bf16 %v452_v20, %v451_v19  ;;  %v436_v23 = vld [vmem:[#allocation5 + $0x118] sm:$0xff]  ;;  %v2856_v27 = vpack.c.bf16 %v422_v25, %v421_v24  ;;  %v405_v28 = vld [vmem:[#allocation5 + $0x20] sm:$0xff]  ;;  %v406_v29 = vld [vmem:[#allocation5 + $0x28] sm:$0xff]  ;;  %vm3654_vm1 = vcmp.ge.s32.totalorder %v293_v14, 1  ;;  %vm3685_vm3 = vcmp.le.s32.totalorder %v293_v14, 6  ;;  %p3336_p2 = pnand %p3335_p11, %p4430_p0  ;;  %s3338_s6 = sshll.u32 %s3412_s7, 4  ;;  %s3339_s6 = int_to_ptr.vmem [resolvable:$false] %s3338_s6 }
  0x70   : > { %v2886_v26 = vpack.c.bf16 %v436_v23, %v435_v21  ;;  %v453_v30 = vld [vmem:[#allocation5 + $0x1a0] sm:$0xff]  ;;  %v454_v31 = vld [vmem:[#allocation5 + $0x1a8] sm:$0xff]  ;;  %v2858_v34 = vpack.c.bf16 %v406_v29, %v405_v28  ;;  %v423_v36 = vld [vmem:[#allocation5 + $0xb0] sm:$0xff]  ;;  %s3340_s8 = scalar_lea.vmem %s3339_s6, 2048  ;;  %p3341_p7 = scmp.lt.s32.totalorder %s4295_s28, %s3339_s6 }
  0x71   : > { %2885 = vmatprep.subr.bf16.mxu1 %v2884_v22  ;;  %v437_v32 = vld [vmem:[#allocation5 + $0x120] sm:$0xff]  ;;  %v438_v33 = vld [vmem:[#allocation5 + $0x128] sm:$0xff]  ;;  %2855 = vmatpush3.bf16.msra.mxu0 %v2854_v18  ;;  %v2888_v35 = vpack.c.bf16 %v454_v31, %v453_v30  ;;  %v424_v37 = vld [vmem:[#allocation5 + $0xb8] sm:$0xff]  ;;  %v3647_v22 = vrot.slane %v3411_v0, 7  ;;  %p3337_p3 = pneg %p3336_p2  ;;  %p3342_p9 = scmp.lt.s32.totalorder %s3340_s8, %s3334_s17 }
  0x72   : > { %v407_v38 = vld [vmem:[#allocation5 + $0x30] sm:$0xff]  ;;  %2857 = vmatprep.subr.bf16.mxu0 %v2856_v27  ;;  %v2890_v39 = vpack.c.bf16 %v438_v33, %v437_v32  ;;  %v2860_v40 = vpack.c.bf16 %v424_v37, %v423_v36  ;;  %v408_v41 = vld [vmem:[#allocation5 + $0x38] sm:$0xff]  ;;  %v425_v47 = vld [vmem:[#allocation5 + $0xc0] sm:$0xff] }
  0x73   : > { %2887 = vmatpush3.bf16.msra.mxu1 %v2886_v26  ;;  %v455_v42 = vld [vmem:[#allocation5 + $0x1b0] sm:$0xff]  ;;  %v456_v43 = vld [vmem:[#allocation5 + $0x1b8] sm:$0xff]  ;;  %v426_v48 = vld [vmem:[#allocation5 + $0xc8] sm:$0xff]  ;;  %v2862_v50 = vpack.c.bf16 %v408_v41, %v407_v38  ;;  %p3343_p12 = por %p3342_p9, %p3341_p7 }
  0x74   : > { %2889 = vmatprep.subr.bf16.mxu1 %v2888_v35  ;;  %v2892_v44 = vpack.c.bf16 %v456_v43, %v455_v42  ;;  %v439_v45 = vld [vmem:[#allocation5 + $0x130] sm:$0xff]  ;;  %v440_v46 = vld [vmem:[#allocation5 + $0x138] sm:$0xff]  ;;  %v457_v51 = vld [vmem:[#allocation5 + $0x1c0] sm:$0xff]  ;;  %v2864_v54 = vpack.c.bf16 %v426_v48, %v425_v47  ;;  %v3673_v47 = vrot.slane %v3411_v0, 1 }
  0x75   : > { %2859 = vmatpush3.bf16.msra.mxu0 %v2858_v34  ;;  %v458_v52 = vld [vmem:[#allocation5 + $0x1c8] sm:$0xff]  ;;  %v2894_v53 = vpack.c.bf16 %v440_v46, %v439_v45  ;;  %v409_v55 = vld [vmem:[#allocation5 + $0x40] sm:$0xff]  ;;  %v427_v60 = vld [vmem:[#allocation5 + $0xd0] sm:$0xff]  ;;  %p3344_p1 = pnand %p3343_p12, %p3337_p3 }
  0x76   : > { %2861 = vmatprep.subr.bf16.mxu0 %v2860_v40  ;;  %v410_v56 = vld [vmem:[#allocation5 + $0x48] sm:$0xff]  ;;  %v441_v57 = vld [vmem:[#allocation5 + $0x140] sm:$0xff]  ;;  %v2896_v58 = vpack.c.bf16 %v458_v52, %v457_v51  ;;  %v428_v61 = vld [vmem:[#allocation5 + $0xd8] sm:$0xff] }
  0x77   : > { %2891 = vmatpush3.bf16.msra.mxu1 %v2890_v39  ;;  %v442_v59 = vld [vmem:[#allocation5 + $0x148] sm:$0xff]  ;;  %v459_v62 = vld [vmem:[#allocation5 + $0x1d0] sm:$0xff]  ;;  %v460_v63 = vld [vmem:[#allocation5 + $0x1d8] sm:$0xff]  ;;  %v2866_v2 = vpack.c.bf16 %v410_v56, %v409_v55  ;;  %v2868_v4 = vpack.c.bf16 %v428_v61, %v427_v60  ;;  %v3677_v56 = vadd.s32 16, %v3643_v1 }
  0x78   : > { %2893 = vmatprep.subr.bf16.mxu1 %v2892_v44  ;;  %v2898_v3 = vpack.c.bf16 %v442_v59, %v441_v57  ;;  %v411_v5 = vld [vmem:[#allocation5 + $0x50] sm:$0xff]  ;;  %v412_v6 = vld [vmem:[#allocation5 + $0x58] sm:$0xff]  ;;  %v2900_v8 = vpack.c.bf16 %v460_v63, %v459_v62  ;;  %v429_v10 = vld [vmem:[#allocation5 + $0xe0] sm:$0xff]  ;;  %v282_v44 = vadd.s32 8, %v3643_v1 }
  0x79   : > { %2863 = vmatpush3.bf16.msra.mxu0 %v2862_v50  ;;  %v443_v7 = vld [vmem:[#allocation5 + $0x150] sm:$0xff]  ;;  %v444_v9 = vld [vmem:[#allocation5 + $0x158] sm:$0xff]  ;;  %v430_v11 = vld [vmem:[#allocation5 + $0xe8] sm:$0xff]  ;;  %v2870_v15 = vpack.c.bf16 %v412_v6, %v411_v5 }
  0x7a   : > { %2865 = vmatprep.subr.bf16.mxu0 %v2864_v54  ;;  %v461_v12 = vld [vmem:[#allocation5 + $0x1e0] sm:$0xff]  ;;  %v462_v13 = vld [vmem:[#allocation5 + $0x1e8] sm:$0xff]  ;;  %v2902_v17 = vpack.c.bf16 %v444_v9, %v443_v7  ;;  %v2872_v18 = vpack.c.bf16 %v430_v11, %v429_v10  ;;  %v431_v24 = vld [vmem:[#allocation5 + $0xf0] sm:$0xff]  ;;  %v300_v57 = vand.u32 7, %v282_v44 }
  0x7b   : > { %2895 = vmatpush3.bf16.msra.mxu1 %v2894_v53  ;;  %v413_v16 = vld [vmem:[#allocation5 + $0x60] sm:$0xff]  ;;  %v414_v19 = vld [vmem:[#allocation5 + $0x68] sm:$0xff]  ;;  %v2904_v23 = vpack.c.bf16 %v462_v13, %v461_v12  ;;  %v432_v25 = vld [vmem:[#allocation5 + $0xf8] sm:$0xff]  ;;  %v307_v12 = vand.u32 7, %v3677_v56  ;;  %v3694_v13 = vadd.s32 24, %v3643_v1 }
  0x7c   : > { %2897 = vmatprep.subr.bf16.mxu1 %v2896_v58  ;;  %v445_v20 = vld [vmem:[#allocation5 + $0x160] sm:$0xff]  ;;  %v446_v21 = vld [vmem:[#allocation5 + $0x168] sm:$0xff]  ;;  %v463_v27 = vld [vmem:[#allocation5 + $0x1f0] sm:$0xff]  ;;  %v2874_v31 = vpack.c.bf16 %v414_v19, %v413_v16  ;;  %v2876_v33 = vpack.c.bf16 %v432_v25, %v431_v24  ;;  %vm3699_vm4 = vcmp.ge.s32.totalorder %v300_v57, 1  ;;  %vm3715_vm5 = vcmp.le.s32.totalorder %v300_v57, 6 }
  0x7d   : > { %2867 = vmatpush3.bf16.msra.mxu0 %v2866_v2  ;;  %v3650_v26 = vld [vmem:[%s3632_s12] sm:$0xff]  ;;  %v464_v28 = vld [vmem:[#allocation5 + $0x1f8] sm:$0xff]  ;;  %v2906_v32 = vpack.c.bf16 %v446_v21, %v445_v20  ;;  %v415_v34 = vld [vmem:[#allocation5 + $0x70] sm:$0xff]  ;;  %vm3733_vm6 = vcmp.ge.s32.totalorder %v307_v12, 1  ;;  %vm3748_vm7 = vcmp.le.s32.totalorder %v307_v12, 6 }
  0x7e   : > { %2869 = vmatprep.subr.bf16.mxu0 %v2868_v4  ;;  %v573_v30 = vrot.slane %v3650_v26, 7  ;;  %v416_v35 = vld [vmem:[#allocation5 + $0x78] sm:$0xff]  ;;  %v447_v36 = vld [vmem:[#allocation5 + $0x170] sm:$0xff]  ;;  %v2908_v38 = vpack.c.bf16 %v464_v28, %v463_v27  ;;  %v481_v40 = vld [vmem:[#allocation5 + $0x280] sm:$0xff]  ;;  %v622_v52 = vrot.slane %v3650_v26, 1 }
  0x7f   : > { %2899 = vmatpush3.bf16.msra.mxu1 %v2898_v3  ;;  %v448_v39 = vld [vmem:[#allocation5 + $0x178] sm:$0xff]  ;;  %v482_v41 = vld [vmem:[#allocation5 + $0x288] sm:$0xff]  ;;  %v513_v42 = vld [vmem:[#allocation5 + $0x380] sm:$0xff]  ;;  %v2878_v45 = vpack.c.bf16 %v416_v35, %v415_v34 }
  0x80   : > { %2901 = vmatprep.subr.bf16.mxu1 %v2900_v8  ;;  %v3663_v37 = vsel %vm4360_vm0, %v3647_v22, %v573_v30  ;;  %v514_v43 = vld [vmem:[#allocation5 + $0x388] sm:$0xff]  ;;  %v2910_v48 = vpack.c.bf16 %v448_v39, %v447_v36  ;;  %v2912_v49 = vpack.c.bf16 %v482_v41, %v481_v40  ;;  %v465_v50 = vld [vmem:[#allocation5 + $0x200] sm:$0xff]  ;;  %v483_v58 = vld [vmem:[#allocation5 + $0x290] sm:$0xff]  ;;  %v623_v4 = vsel %vm4357_vm2, %v3673_v47, %v622_v52 }
  0x81   : > { %2871 = vmatpush3.bf16.msra.mxu0 %v2870_v15  ;;  %2168 = vmatprep.mubr.msk.f32.mxu1 %vm3654_vm1, %v3663_v37  ;;  %v3670_v46 = vld [vmem:[%s3632_s12 + $0x8] sm:$0xff]  ;;  %v2944_v53 = vpack.c.bf16 %v514_v43, %v513_v42  ;;  %v497_v54 = vld [vmem:[#allocation5 + $0x300] sm:$0xff]  ;;  %v484_v59 = vld [vmem:[#allocation5 + $0x298] sm:$0xff]  ;;  %v314_v36 = vand.u32 7, %v3694_v13 }
  0x82   : > { %2873 = vmatprep.subr.bf16.mxu0 %v2872_v18  ;;  %v466_v51 = vld [vmem:[#allocation5 + $0x208] sm:$0xff]  ;;  %v575_v60 = vrot.slane %v3670_v46, 7  ;;  %v515_v62 = vld [vmem:[#allocation5 + $0x390] sm:$0xff]  ;;  %v516_v63 = vld [vmem:[#allocation5 + $0x398] sm:$0xff]  ;;  %v624_v8 = vrot.slane %v3670_v46, 1  ;;  %v2916_v9 = vpack.c.bf16 %v484_v59, %v483_v58 }
  0x83   : > { %2903 = vmatpush3.bf16.msra.mxu1 %v2902_v17  ;;  %v498_v55 = vld [vmem:[#allocation5 + $0x308] sm:$0xff]  ;;  %v2914_v61 = vpack.c.bf16 %v466_v51, %v465_v50  ;;  %v3681_v2 = vld [vmem:[%s3632_s12 + $0x10] sm:$0xff]  ;;  %v468_v7 = vld [vmem:[#allocation5 + $0x218] sm:$0xff]  ;;  %v2948_v16 = vpack.c.bf16 %v516_v63, %v515_v62  ;;  %vm3766_vm8 = vcmp.ge.s32.totalorder %v314_v36, 1  ;;  %vm3781_vm9 = vcmp.le.s32.totalorder %v314_v36, 6 }
  0x84   : > { %2905 = vmatprep.subr.bf16.mxu1 %v2904_v23  ;;  %v2946_v5 = vpack.c.bf16 %v498_v55, %v497_v54  ;;  %v467_v6 = vld [vmem:[#allocation5 + $0x210] sm:$0xff]  ;;  %v500_v11 = vld [vmem:[#allocation5 + $0x318] sm:$0xff]  ;;  %v3706_v15 = vsel %vm4360_vm0, %v573_v30, %v575_v60  ;;  %v485_v17 = vld [vmem:[#allocation5 + $0x2a0] sm:$0xff]  ;;  %v577_v19 = vrot.slane %v3681_v2, 7  ;;  %v3720_v27 = vsel %vm4357_vm2, %v622_v52, %v624_v8 }
  0x85   : > { %2875 = vmatpush3.bf16.msra.mxu0 %v2874_v31  ;;  %v499_v10 = vld [vmem:[#allocation5 + $0x310] sm:$0xff]  ;;  %v486_v18 = vld [vmem:[#allocation5 + $0x2a8] sm:$0xff]  ;;  %v2918_v20 = vpack.c.bf16 %v468_v7, %v467_v6  ;;  %v517_v21 = vld [vmem:[#allocation5 + $0x3a0] sm:$0xff] }
  0x86   : > { %2877 = vmatprep.subr.bf16.mxu0 %v2876_v33  ;;  %v518_v23 = vld [vmem:[#allocation5 + $0x3a8] sm:$0xff]  ;;  %v3712_v24 = vld [vmem:[%s3632_s12 + $0x18] sm:$0xff]  ;;  %v2950_v28 = vpack.c.bf16 %v500_v11, %v499_v10  ;;  %v469_v30 = vld [vmem:[#allocation5 + $0x220] sm:$0xff]  ;;  %v2920_v33 = vpack.c.bf16 %v486_v18, %v485_v17  ;;  %v3738_v40 = vsel %vm4360_vm0, %v575_v60, %v577_v19  ;;  %v3761_v60 = vadd.s32 40, %v3643_v1 }
  0x87   : > { %2907 = vmatpush3.bf16.msra.mxu1 %v2906_v32  ;;  %v470_v31 = vld [vmem:[#allocation5 + $0x228] sm:$0xff]  ;;  %v626_v32 = vrot.slane %v3681_v2, 1  ;;  %v501_v34 = vld [vmem:[#allocation5 + $0x320] sm:$0xff]  ;;  %v2952_v41 = vpack.c.bf16 %v518_v23, %v517_v21  ;;  %v487_v42 = vld [vmem:[#allocation5 + $0x2b0] sm:$0xff]  ;;  %v579_v44 = vrot.slane %v3712_v24, 7  ;;  %v628_v55 = vrot.slane %v3712_v24, 1 }
  0x88   : > { %2909 = vmatprep.subr.bf16.mxu1 %v2908_v38  ;;  %v502_v35 = vld [vmem:[#allocation5 + $0x328] sm:$0xff]  ;;  %v3728_v38 = vadd.s32 32, %v3643_v1  ;;  %v488_v43 = vld [vmem:[#allocation5 + $0x2b8] sm:$0xff]  ;;  %v503_v57 = vld [vmem:[#allocation5 + $0x330] sm:$0xff]  ;;  %v328_v23 = vand.u32 7, %v3761_v60 }
  0x89   : > { %2879 = vmatpush3.bf16.msra.mxu0 %v2878_v45  ;;  %v2922_v45 = vpack.c.bf16 %v470_v31, %v469_v30  ;;  %v3753_v51 = vsel %vm4357_vm2, %v624_v8, %v626_v32  ;;  %v2954_v52 = vpack.c.bf16 %v502_v35, %v501_v34  ;;  %v472_v54 = vld [vmem:[#allocation5 + $0x238] sm:$0xff]  ;;  %v2924_v56 = vpack.c.bf16 %v488_v43, %v487_v42  ;;  %v521_v8 = vld [vmem:[#allocation5 + $0x3c0] sm:$0xff]  ;;  %v3778_v10 = vld [vmem:[%s3632_s12 + $0x28] sm:$0xff] }
  0x8a   : > { %2913 = vmatprep.subr.bf16.mxu0 %v2912_v49  ;;  %v3745_v49 = vld [vmem:[%s3632_s12 + $0x20] sm:$0xff]  ;;  %v504_v58 = vld [vmem:[#allocation5 + $0x338] sm:$0xff]  ;;  %v321_v59 = vand.u32 7, %v3728_v38  ;;  %v3771_v62 = vsel %vm4360_vm0, %v577_v19, %v579_v44  ;;  %v3786_v12 = vsel %vm4357_vm2, %v626_v32, %v628_v55  ;;  %v474_v17 = vld [vmem:[#allocation5 + $0x248] sm:$0xff]  ;;  %v4396_v30 = vmov 0 }
  0x8b   : > { %2911 = vmatpush3.bf16.msra.mxu1 %v2910_v48  ;;  %v520_v48 = vld [vmem:[#allocation5 + $0x3b8] sm:$0xff]  ;;  %v581_v6 = vrot.slane %v3745_v49, 7  ;;  %v2958_v13 = vpack.c.bf16 %v504_v58, %v503_v57  ;;  %v630_v18 = vrot.slane %v3745_v49, 1  ;;  %v506_v21 = vld [vmem:[#allocation5 + $0x348] sm:$0xff]  ;;  %v583_v35 = vrot.slane %v3778_v10, 7  ;;  %v523_v38 = vld [vmem:[#allocation5 + $0x3d0] sm:$0xff] }
  0x8c   : > { %2945 = vmatprep.subr.bf16.mxu1 %v2944_v53  ;;  %2160 = vmatmul.mubr.msk.f32.vlgmr.msra.gmra.mrb[0].mxu0 %vm3654_vm1, %v3647_v22  ;;  %v471_v53 = vld [vmem:[#allocation5 + $0x230] sm:$0xff]  ;;  %vm3799_vm10 = vcmp.ge.s32.totalorder %v321_v59, 1  ;;  %v492_v34 = vld [vmem:[#allocation5 + $0x2d8] sm:$0xff]  ;;  %vm3814_vm11 = vcmp.le.s32.totalorder %v321_v59, 6  ;;  %vm3825_vm12 = vcmp.ge.s32.totalorder %v328_v23, 1  ;;  %vm3847_vm13 = vcmp.le.s32.totalorder %v328_v23, 6 }
  0x8d   : > { %2915 = vmatpush3.bf16.msra.mxu0 %v2914_v61  ;;  %770 = vmatprep.mubr.f32.mxu0 %v3650_v26  ;;  %v4392_v61 = vmov 0  ;;  %v2926_v7 = vpack.c.bf16 %v472_v54, %v471_v53  ;;  %v4397_v30 = vsel %vm3799_vm10, 4294967295, %v4396_v30  ;;  %v3804_v31 = vsel %vm4360_vm0, %v579_v44, %v581_v6  ;;  %v3811_v42 = vld [vmem:[%s3632_s12 + $0x30] sm:$0xff]  ;;  %v508_v57 = vld [vmem:[#allocation5 + $0x358] sm:$0xff]  ;;  %v2208_v25 = vld [vmem:[%s4352_s4] ss:$0 sm:$0xff] }
  0x8e   : > { %2169 = vmatmul.mubr.msk.f32.vlgmr.msra.gmra.mrb[0].mxu1 %vm3685_vm3, %v623_v4  ;;  %2917 = vmatprep.subr.bf16.mxu0 %v2916_v9  ;;  %v4393_v61 = vsel %vm3766_vm8, 4294967295, %v4392_v61  ;;  %v489_v4 = vld [vmem:[#allocation5 + $0x2c0] sm:$0xff]  ;;  %v522_v9 = vld [vmem:[#allocation5 + $0x3c8] sm:$0xff]  ;;  %v3819_v44 = vsel %vm4357_vm2, %v628_v55, %v630_v18  ;;  %v4400_v53 = vmov 0  ;;  %v3830_v55 = vadd.s32 56, %v3643_v1 }
  0x8f   : > { %2947 = vmatpush3.bf16.msra.mxu1 %v2946_v5  ;;  %2170 = vmatprep.mubr.msk.f32.mxu1 %vm3699_vm4, %v3706_v15  ;;  %v490_v5 = vld [vmem:[#allocation5 + $0x2c8] sm:$0xff]  ;;  %v2960_v32 = vpack.c.bf16 %v522_v9, %v521_v8  ;;  %v4401_v53 = vsel %vm3825_vm12, 4294967295, %v4400_v53  ;;  %v3836_v58 = vsel %vm4360_vm0, %v581_v6, %v583_v35  ;;  %v3844_v9 = vld [vmem:[%s3632_s12 + $0x38] sm:$0xff] }
  0x90   : > { %2161 = vmatmul.mubr.msk.f32.gmra.mrb[2].mxu0 %vm3699_vm4, %v3663_v37  ;;  %2949 = vmatprep.subr.bf16.mxu1 %v2948_v16  ;;  %v519_v37 = vld [vmem:[#allocation5 + $0x3b0] sm:$0xff]  ;;  %v473_v16 = vld [vmem:[#allocation5 + $0x240] sm:$0xff]  ;;  %v2928_v19 = vpack.c.bf16 %v490_v5, %v489_v4  ;;  %v494_v4 = vld [vmem:[#allocation5 + $0x2e8] sm:$0xff]  ;;  %v585_v5 = vrot.slane %v3811_v42, 7  ;;  %v342_v23 = vand.u32 7, %v3830_v55 }
  0x91   : > { %2919 = vmatpush3.bf16.msra.mxu0 %v2918_v20  ;;  %775 = vmatprep.mubr.f32.mxu0 %v3670_v46  ;;  %v2956_v63 = vpack.c.bf16 %v520_v48, %v519_v37  ;;  %v505_v20 = vld [vmem:[#allocation5 + $0x340] sm:$0xff]  ;;  %v2930_v36 = vpack.c.bf16 %v474_v17, %v473_v16  ;;  %v475_v37 = vld [vmem:[#allocation5 + $0x250] sm:$0xff]  ;;  %v476_v48 = vld [vmem:[#allocation5 + $0x258] sm:$0xff] }
  0x92   : > { %2171 = vmatmul.mubr.msk.f32.gmra.mrb[2].mxu1 %vm3715_vm5, %v3720_v27  ;;  %2921 = vmatprep.subr.bf16.mxu0 %v2920_v33  ;;  %v491_v33 = vld [vmem:[#allocation5 + $0x2d0] sm:$0xff]  ;;  %v526_v8 = vld [vmem:[#allocation5 + $0x3e8] sm:$0xff]  ;;  %v477_v17 = vld [vmem:[#allocation5 + $0x260] sm:$0xff] }
  0x93   : > { %2951 = vmatpush3.bf16.msra.mxu1 %v2950_v28  ;;  %2172 = vmatprep.mubr.msk.f32.mxu1 %vm3733_vm6, %v3738_v40  ;;  %v3794_v28 = vadd.s32 48, %v3643_v1  ;;  %v2932_v54 = vpack.c.bf16 %v492_v34, %v491_v33  ;;  %v2934_v1 = vpack.c.bf16 %v476_v48, %v475_v37  ;;  %v3867_v33 = vsel %vm4360_vm0, %v583_v35, %v585_v5  ;;  %v527_v37 = vld [vmem:[#allocation5 + $0x3f0] sm:$0xff]  ;;  %v528_v48 = vld [vmem:[#allocation5 + $0x3f8] sm:$0xff] }
  0x94   : > { %2162 = vmatmul.mubr.msk.f32.gmra.mrb[4].mxu0 %vm3733_vm6, %v3706_v15  ;;  %2953 = vmatprep.subr.bf16.mxu1 %v2952_v41  ;;  %v524_v41 = vld [vmem:[#allocation5 + $0x3d8] sm:$0xff] }
  0x95   : > { %2923 = vmatpush3.bf16.msra.mxu0 %v2922_v45  ;;  %780 = vmatprep.mubr.f32.mxu0 %v3681_v2  ;;  %v2962_v45 = vpack.c.bf16 %v506_v21, %v505_v20  ;;  %v2964_v59 = vpack.c.bf16 %v524_v41, %v523_v38  ;;  %v335_v60 = vand.u32 7, %v3794_v28  ;;  %v634_v20 = vrot.slane %v3811_v42, 1  ;;  %v509_v28 = vld [vmem:[#allocation5 + $0x360] sm:$0xff]  ;;  %v496_v38 = vld [vmem:[#allocation5 + $0x2f8] sm:$0xff] }
  0x96   : > { %2173 = vmatmul.mubr.msk.f32.gmra.mrb[4].mxu1 %vm3748_vm7, %v3753_v51  ;;  %2925 = vmatprep.subr.bf16.mxu0 %v2924_v56  ;;  %v507_v56 = vld [vmem:[#allocation5 + $0x350] sm:$0xff]  ;;  %v654_v41 = vrot.slane %v3844_v9, 7  ;;  %v480_v55 = vld [vmem:[#allocation5 + $0x278] sm:$0xff] }
  0x97   : > { %2955 = vmatpush3.bf16.msra.mxu1 %v2954_v52  ;;  %2174 = vmatprep.mubr.msk.f32.mxu1 %vm3766_vm8, %v3771_v62  ;;  %v632_v52 = vrot.slane %v3778_v10, 1  ;;  %v2966_v16 = vpack.c.bf16 %v508_v57, %v507_v56  ;;  %vm3862_vm14 = vcmp.ge.s32.totalorder %v335_v60, 1  ;;  %vm3874_vm15 = vcmp.le.s32.totalorder %v335_v60, 6  ;;  %v479_v57 = vld [vmem:[#allocation5 + $0x270] sm:$0xff] }
  0x98   : > { %2163 = vmatmul.mubr.msk.f32.gmra.mrb[6].mxu0 %vm3766_vm8, %v3738_v40  ;;  %2957 = vmatprep.subr.bf16.mxu1 %v2956_v63  ;;  %v493_v63 = vld [vmem:[#allocation5 + $0x2e0] sm:$0xff]  ;;  %v3895_v60 = vsel %vm4360_vm0, %v585_v5, %v654_v41  ;;  %vm4412_vm0 = vcmask 1046528  }
  0x99   : > { %2927 = vmatpush3.bf16.msra.mxu0 %v2926_v7  ;;  %785 = vmatprep.mubr.f32.mxu0 %v3712_v24  ;;  %v525_v7 = vld [vmem:[#allocation5 + $0x3e0] sm:$0xff]  ;;  %v2936_v21 = vpack.c.bf16 %v494_v4, %v493_v63  ;;  %v3879_v35 = vsel %vm4357_vm2, %v632_v52, %v634_v20  ;;  %v511_v4 = vld [vmem:[#allocation5 + $0x370] sm:$0xff] }
  0x9a   : > { %2175 = vmatmul.mubr.msk.f32.gmra.mrb[6].mxu1 %vm3781_vm9, %v3786_v12  ;;  %2929 = vmatprep.subr.bf16.mxu0 %v2928_v19  ;;  %v478_v19 = vld [vmem:[#allocation5 + $0x268] sm:$0xff]  ;;  %v2968_v34 = vpack.c.bf16 %v526_v8, %v525_v7  ;;  %v2972_v7 = vpack.c.bf16 %v528_v48, %v527_v37  ;;  %v529_v8 = vld [vmem:[#allocation5 + $0x400] sm:$0xff]  ;;  %v540_v48 = vld [vmem:[#allocation5 + $0x458] sm:$0xff] }
  0x9b   : > { %2959 = vmatpush3.bf16.msra.mxu1 %v2958_v13  ;;  %2176 = vmatprep.mubr.msk.f32.mxu1 %vm3799_vm10, %v3804_v31  ;;  %v3852_v13 = vsel %vm4357_vm2, %v630_v18, %v632_v52  ;;  %v4404_v18 = vmov 0  ;;  %vm3888_vm2 = vcmp.ge.s32.totalorder %v342_v23, 1  ;;  %v538_v37 = vld [vmem:[#allocation5 + $0x448] sm:$0xff] }
  0x9c   : > { %2164 = vmatmul.mubr.msk.f32.gmra.mrb[8].mxu0 %vm3799_vm10, %v3771_v62  ;;  %2961 = vmatprep.subr.bf16.mxu1 %v2960_v32  ;;  %v510_v32 = vld [vmem:[#allocation5 + $0x368] sm:$0xff]  ;;  %v4405_v18 = vsel %vm3862_vm14, 4294967295, %v4404_v18 }
  0x9d   : > { %2931 = vmatpush3.bf16.msra.mxu0 %v2930_v36  ;;  %790 = vmatprep.mubr.f32.mxu0 %v3745_v49  ;;  %v495_v36 = vld [vmem:[#allocation5 + $0x2f0] sm:$0xff]  ;;  %v2970_v56 = vpack.c.bf16 %v510_v32, %v509_v28 }
  0x9e   : > { %2177 = vmatmul.mubr.msk.f32.gmra.mrb[8].mxu1 %vm3814_vm11, %v3819_v44  ;;  %2933 = vmatprep.subr.bf16.mxu0 %v2932_v54  ;;  %v4406_v54 = vmov 0  ;;  %v2940_v63 = vpack.c.bf16 %v496_v38, %v495_v36  ;;  %v531_v32 = vld [vmem:[#allocation5 + $0x410] sm:$0xff]  ;;  %v534_v36 = vld [vmem:[#allocation5 + $0x428] sm:$0xff] }
  0x9f   : > { %2963 = vmatpush3.bf16.msra.mxu1 %v2962_v45  ;;  %2178 = vmatprep.mubr.msk.f32.mxu1 %vm3825_vm12, %v3836_v58  ;;  %v2938_v45 = vpack.c.bf16 %v478_v19, %v477_v17  ;;  %v4407_v54 = vsel %vm3874_vm15, 4294967295, %v4406_v54  ;;  %v2942_v17 = vpack.c.bf16 %v480_v55, %v479_v57  ;;  %v4410_v19 = vmov 0  ;;  %v535_v38 = vld [vmem:[#allocation5 + $0x430] sm:$0xff]  ;;  %v544_v57 = vld [vmem:[#allocation5 + $0x478] sm:$0xff] }
  0xa0   : > { %2165 = vmatmul.mubr.msk.f32.gmra.mrb[10].mxu0 %vm3825_vm12, %v3804_v31  ;;  %2965 = vmatprep.subr.bf16.mxu1 %v2964_v59  ;;  %v636_v59 = vrot.slane %v3844_v9, 1  ;;  %v1236_v55 = vld [vmem:[#allocation7 + $0x10] sm:$0xff] }
  0xa1   : > { %2935 = vmatpush3.bf16.msra.mxu0 %v2934_v1  ;;  %795 = vmatprep.mubr.f32.mxu0 %v3778_v10  ;;  %v512_v1 = vld [vmem:[#allocation5 + $0x378] sm:$0xff] }
  0xa2   : > { %2179 = vmatmul.mubr.msk.f32.gmra.mrb[10].mxu1 %vm3847_vm13, %v3852_v13  ;;  %2937 = vmatprep.subr.bf16.mxu0 %v2936_v21  ;;  %v3908_v5 = vsel %vm4412_vm0, %v634_v20, %v636_v59  ;;  %v2974_v21 = vpack.c.bf16 %v512_v1, %v511_v4  ;;  %v1282_v4 = vld [vmem:[#allocation7 + $0x180] sm:$0xff]  ;;  %v1283_v1 = vld [vmem:[#allocation7 + $0x188] sm:$0xff] }
  0xa3   : > { %2967 = vmatpush3.bf16.msra.mxu1 %v2966_v16  ;;  %2180 = vmatprep.mubr.msk.f32.mxu1 %vm3862_vm14, %v3867_v33  ;;  %v530_v16 = vld [vmem:[#allocation5 + $0x408] sm:$0xff] }
  0xa4   : > { %2166 = vmatmul.mubr.msk.f32.gmra.mrb[12].mxu0 %vm3862_vm14, %v3836_v58  ;;  %2969 = vmatprep.subr.bf16.mxu1 %v2968_v34  ;;  %vm3901_vm14 = vcmp.le.s32.totalorder %v342_v23, 6  ;;  %v2976_v28 = vpack.c.bf16 %v530_v16, %v529_v8  ;;  %v532_v34 = vld [vmem:[#allocation5 + $0x418] sm:$0xff]  ;;  %v533_v23 = vld [vmem:[#allocation5 + $0x420] sm:$0xff]  ;;  %v1267_v8 = vld [vmem:[#allocation7 + $0x108] sm:$0xff] }
  0xa5   : > { %2939 = vmatpush3.bf16.msra.mxu0 %v2938_v45  ;;  %800 = vmatprep.mubr.f32.mxu0 %v3811_v42  ;;  %v4411_v19 = vsel %vm3901_vm14, 4294967295, %v4410_v19  ;;  %v2980_v20 = vpack.c.bf16 %v532_v34, %v531_v32  ;;  %v536_v45 = vld [vmem:[#allocation5 + $0x438] sm:$0xff]  ;;  %v1239_v32 = vld [vmem:[#allocation7 + $0x28] sm:$0xff] }
  0xa6   : > { %2181 = vmatmul.mubr.msk.f32.gmra.mrb[12].mxu1 %vm3874_vm15, %v3879_v35  ;;  %2941 = vmatprep.subr.bf16.mxu0 %v2940_v63 }
  0xa7   : > { %2971 = vmatpush3.bf16.msra.mxu1 %v2970_v56  ;;  %2182 = vmatprep.mubr.msk.f32.mxu1 %vm3888_vm2, %v3895_v60  ;;  %v542_v56 = vld [vmem:[#allocation5 + $0x468] sm:$0xff] }
  0xa8   : > { %2167 = vmatmul.mubr.msk.f32.gmra.mrb[14].mxu0 %vm3888_vm2, %v3867_v33  ;;  %2973 = vmatprep.subr.bf16.mxu1 %v2972_v7  ;;  %v1266_v7 = vld [vmem:[#allocation7 + $0x100] sm:$0xff] }
  0xa9   : > { %2943 = vmatpush3.bf16.msra.mxu0 %v2942_v17  ;;  %2184 = vmatprep.mubr.msk.f32.mxu0 %vm3685_vm3, %v3720_v27  ;;  %v2984_v27 = vpack.c.bf16 %v534_v36, %v533_v23  ;;  %v3042_v16 = vpack.c.bf16 %v1267_v8, %v1266_v7  ;;  %v1254_v17 = vld [vmem:[#allocation7 + $0xa0] sm:$0xff]  ;;  %v1285_v23 = vld [vmem:[#allocation7 + $0x198] sm:$0xff]  ;;  %v1291_v8 = vld [vmem:[#allocation7 + $0x1c8] sm:$0xff] }
  0xaa   : > { %2183 = vmatmul.mubr.msk.f32.gmra.mrb[14].mxu1 %vm3901_vm14, %v3908_v5  ;;  %2977 = vmatprep.subr.bf16.mxu0 %v2976_v28  ;;  %v1290_v7 = vld [vmem:[#allocation7 + $0x1c0] sm:$0xff] }
  0xab   : > { %2975 = vmatpush3.bf16.msra.mxu1 %v2974_v21  ;;  %1080 = vmatprep.mubr.f32.mxu1 %v3670_v46 }
  0xac   : > { %976 = vmatmul.mubr.f32.vlgmr.msra.gmra.mrb[16].mxu0 %v3650_v26  ;;  %v2988_v26 = vpack.c.bf16 %v536_v45, %v535_v38  ;;  %v1269_v38 = vld [vmem:[#allocation7 + $0x118] sm:$0xff] }
  0xad   : > { %2979 = vmatpush3.bf16.msra.mxu0 %v2976_v28  ;;  %2185 = vmatprep.mubr.msk.f32.mxu0 %vm3715_vm5, %v3753_v51  ;;  %v1238_v28 = vld [vmem:[#allocation7 + $0x20] sm:$0xff] }
  0xae   : > { %2192 = vmatmul.mubr.msk.f32.vlgmr.msra.gmra.mrb[16].mxu1 %vm3654_vm1, %v3706_v15  ;;  %2981 = vmatprep.subr.bf16.mxu0 %v2980_v20  ;;  %v537_v15 = vld [vmem:[#allocation5 + $0x440] sm:$0xff]  ;;  %v3018_v34 = vpack.c.bf16 %v1239_v32, %v1238_v28  ;;  %v1263_v32 = vld [vmem:[#allocation7 + $0xe8] sm:$0xff] }
  0xaf   : > { %1085 = vmatprep.mubr.f32.mxu1 %v3681_v2  ;;  %v1262_v28 = vld [vmem:[#allocation7 + $0xe0] sm:$0xff] }
  0xb0   : > { %981 = vmatmul.mubr.f32.gmra.mrb[18].mxu0 %v3670_v46  ;;  %v2992_v46 = vpack.c.bf16 %v538_v37, %v537_v15  ;;  %v1257_v15 = vld [vmem:[#allocation7 + $0xb8] sm:$0xff] }
  0xb1   : > { %2983 = vmatpush3.bf16.msra.mxu0 %v2980_v20  ;;  %2186 = vmatprep.mubr.msk.f32.mxu0 %vm3748_vm7, %v3786_v12  ;;  %v1284_v20 = vld [vmem:[#allocation7 + $0x190] sm:$0xff] }
  0xb2   : > { %2193 = vmatmul.mubr.msk.f32.gmra.mrb[18].mxu1 %vm3699_vm4, %v3738_v40  ;;  %2985 = vmatprep.subr.bf16.mxu0 %v2984_v27  ;;  %v539_v40 = vld [vmem:[#allocation5 + $0x450] sm:$0xff]  ;;  %v3044_v36 = vpack.c.bf16 %v1285_v23, %v1284_v20  ;;  %v1246_v20 = vld [vmem:[#allocation7 + $0x60] sm:$0xff]  ;;  %v1247_v23 = vld [vmem:[#allocation7 + $0x68] sm:$0xff] }
  0xb3   : > { %1090 = vmatprep.mubr.f32.mxu1 %v3712_v24 }
  0xb4   : > { %986 = vmatmul.mubr.f32.gmra.mrb[20].mxu0 %v3681_v2  ;;  %v2996_v2 = vpack.c.bf16 %v540_v48, %v539_v40  ;;  %v1241_v40 = vld [vmem:[#allocation7 + $0x38] sm:$0xff] }
  0xb5   : > { %2987 = vmatpush3.bf16.msra.mxu0 %v2984_v27  ;;  %2187 = vmatprep.mubr.msk.f32.mxu0 %vm3781_vm9, %v3819_v44  ;;  %v1268_v27 = vld [vmem:[#allocation7 + $0x110] sm:$0xff] }
  0xb6   : > { %2194 = vmatmul.mubr.msk.f32.gmra.mrb[20].mxu1 %vm3733_vm6, %v3771_v62  ;;  %2989 = vmatprep.subr.bf16.mxu0 %v2988_v26  ;;  %v541_v62 = vld [vmem:[#allocation5 + $0x460] sm:$0xff]  ;;  %v3046_v45 = vpack.c.bf16 %v1269_v38, %v1268_v27  ;;  %v1292_v27 = vld [vmem:[#allocation7 + $0x1d0] sm:$0xff]  ;;  %v1293_v38 = vld [vmem:[#allocation7 + $0x1d8] sm:$0xff] }
  0xb7   : > { %1095 = vmatprep.mubr.f32.mxu1 %v3745_v49 }
  0xb8   : > { %991 = vmatmul.mubr.f32.gmra.mrb[22].mxu0 %v3712_v24  ;;  %v3000_v24 = vpack.c.bf16 %v542_v56, %v541_v62  ;;  %v1287_v62 = vld [vmem:[#allocation7 + $0x1a8] sm:$0xff] }
  0xb9   : > { %2991 = vmatpush3.bf16.msra.mxu0 %v2988_v26  ;;  %2188 = vmatprep.mubr.msk.f32.mxu0 %vm3814_vm11, %v3852_v13  ;;  %v1256_v26 = vld [vmem:[#allocation7 + $0xb0] sm:$0xff] }
  0xba   : > { %2195 = vmatmul.mubr.msk.f32.gmra.mrb[22].mxu1 %vm3766_vm8, %v3804_v31  ;;  %2993 = vmatprep.subr.bf16.mxu0 %v2992_v46  ;;  %v543_v31 = vld [vmem:[#allocation5 + $0x470] sm:$0xff]  ;;  %v3020_v37 = vpack.c.bf16 %v1257_v15, %v1256_v26  ;;  %v1277_v15 = vld [vmem:[#allocation7 + $0x158] sm:$0xff] }
  0xbb   : > { %1100 = vmatprep.mubr.f32.mxu1 %v3778_v10  ;;  %v1276_v26 = vld [vmem:[#allocation7 + $0x150] sm:$0xff] }
  0xbc   : > { %996 = vmatmul.mubr.f32.gmra.mrb[24].mxu0 %v3745_v49  ;;  %v3004_v49 = vpack.c.bf16 %v544_v57, %v543_v31  ;;  %v1271_v31 = vld [vmem:[#allocation7 + $0x128] sm:$0xff] }
  0xbd   : > { %2995 = vmatpush3.bf16.msra.mxu0 %v2992_v46  ;;  %2189 = vmatprep.mubr.msk.f32.mxu0 %vm3847_vm13, %v3879_v35  ;;  %v1240_v46 = vld [vmem:[#allocation7 + $0x30] sm:$0xff] }
  0xbe   : > { %2196 = vmatmul.mubr.msk.f32.gmra.mrb[24].mxu1 %vm3799_vm10, %v3836_v58  ;;  %2997 = vmatprep.subr.bf16.mxu0 %v2996_v2  ;;  %v665_v58 = vsel %vm4412_vm0, %v636_v59, %v3673_v47  ;;  %vm4413_vm10 = vnez %v4405_v18  ;;  %v1237_v59 = vld [vmem:[#allocation7 + $0x18] sm:$0xff]  ;;  %v3022_v48 = vpack.c.bf16 %v1241_v40, %v1240_v46  ;;  %v1264_v46 = vld [vmem:[#allocation7 + $0xf0] sm:$0xff] }
  0xbf   : > { %1105 = vmatprep.mubr.f32.mxu1 %v3811_v42  ;;  %v3014_v63 = vpack.c.bf16 %v1237_v59, %v1236_v55  ;;  %v1260_v55 = vld [vmem:[#allocation7 + $0xd0] sm:$0xff]  ;;  %v1261_v59 = vld [vmem:[#allocation7 + $0xd8] sm:$0xff] }
  0xc0   : > { %1001 = vmatmul.mubr.f32.gmra.mrb[26].mxu0 %v3778_v10  ;;  %v1265_v40 = vld [vmem:[#allocation7 + $0xf8] sm:$0xff] }
  0xc1   : > { %2999 = vmatpush3.bf16.msra.mxu0 %v2996_v2  ;;  %2190 = vmatprep.mubr.msk.f32.mxu0 %vm3874_vm15, %v3908_v5  ;;  %v1286_v2 = vld [vmem:[#allocation7 + $0x1a0] sm:$0xff] }
  0xc2   : > { %2197 = vmatmul.mubr.msk.f32.gmra.mrb[26].mxu1 %vm3825_vm12, %v3867_v33  ;;  %3001 = vmatprep.subr.bf16.mxu0 %v3000_v24  ;;  %vm4414_vm12 = vcmask 1040384   ;;  %v1252_v33 = vld [vmem:[#allocation7 + $0x90] sm:$0xff]  ;;  %v3048_v56 = vpack.c.bf16 %v1287_v62, %v1286_v2  ;;  %v1249_v62 = vld [vmem:[#allocation7 + $0x78] sm:$0xff] }
  0xc3   : > { %1110 = vmatprep.mubr.f32.mxu1 %v3844_v9  ;;  %v675_v10 = vsel %vm4414_vm12, %v654_v41, %v3647_v22  ;;  %v1253_v41 = vld [vmem:[#allocation7 + $0x98] sm:$0xff]  ;;  %v1248_v2 = vld [vmem:[#allocation7 + $0x70] sm:$0xff] }
  0xc4   : > { %1006 = vmatmul.mubr.f32.gmra.mrb[28].mxu0 %v3811_v42 }
  0xc5   : > { %3003 = vmatpush3.bf16.msra.mxu0 %v3000_v24  ;;  %2191 = vmatprep.mubr.msk.f32.mxu0 %vm3901_vm14, %v665_v58  ;;  %v1270_v24 = vld [vmem:[#allocation7 + $0x120] sm:$0xff] }
  0xc6   : > { %2198 = vmatmul.mubr.msk.f32.gmra.mrb[28].mxu1 %vm4413_vm10, %v3895_v60  ;;  %3005 = vmatprep.subr.bf16.mxu0 %v3004_v49  ;;  %v3040_v60 = vpack.c.bf16 %v1283_v1, %v1282_v4  ;;  %v3050_v57 = vpack.c.bf16 %v1271_v31, %v1270_v24  ;;  %v1244_v4 = vld [vmem:[#allocation7 + $0x50] sm:$0xff]  ;;  %v1245_v1 = vld [vmem:[#allocation7 + $0x58] sm:$0xff]  ;;  %v1294_v24 = vld [vmem:[#allocation7 + $0x1e0] sm:$0xff] }
  0xc7   : > { %1115 = vmatprep.mubr.f32.mxu1 %v3411_v0  ;;  %v1295_v31 = vld [vmem:[#allocation7 + $0x1e8] sm:$0xff] }
  0xc8   : > { %1011 = vmatmul.mubr.f32.gmra.mrb[30].mxu0 %v3844_v9  ;;  %v1235_v9 = vld [vmem:[#allocation7 + $0x8] sm:$0xff] }
  0xc9   : > { %3007 = vmatpush3.bf16.msra.mxu0 %v3004_v49  ;;  %2792 = vmatprep.mubr.msk.f32.mxu0 %vm3685_vm3, %v3753_v51  ;;  %v1250_v51 = vld [vmem:[#allocation7 + $0x80] sm:$0xff] }
  0xca   : > { %2199 = vmatmul.mubr.msk.f32.gmra.mrb[30].mxu1 %vm3888_vm2, %v675_v10  ;;  %3041 = vmatprep.subr.bf16.mxu0 %v3040_v60  ;;  %v1258_v49 = vld [vmem:[#allocation7 + $0xc0] sm:$0xff]  ;;  %v3030_v60 = vpack.c.bf16 %v1245_v1, %v1244_v4  ;;  %v1316_v4 = vld [vmem:[#allocation7 + $0x290] sm:$0xff]  ;;  %v1317_v1 = vld [vmem:[#allocation7 + $0x298] sm:$0xff] }
  0xcb   : > { %1555 = vmatprep.mubr.f32.mxu1 %v3411_v0 }
  0xcc   : > { %2793 = vmatmul.mubr.msk.f32.vlgmr.msra.gmra.mrb[32].mxu0 %vm3715_vm5, %v3786_v12  ;;  %v1251_v12 = vld [vmem:[#allocation7 + $0x88] sm:$0xff] }
  0xcd   : > { %2795 = vmatprep.mubr.msk.f32.mxu0 %vm3748_vm7, %v3819_v44  ;;  %v3008_v42 = vpack.c.bf16 %v1251_v12, %v1250_v51  ;;  %v1234_v44 = vld [vmem:[#allocation7] sm:$0xff]  ;;  %3043 = vmatpush3.bf16.msra.mxu0 %v3042_v16  ;;  %v1243_v12 = vld [vmem:[#allocation7 + $0x48] sm:$0xff]  ;;  %v3056_v16 = vpack.c.bf16 %v1291_v8, %v1290_v7  ;;  %v1300_v7 = vld [vmem:[#allocation7 + $0x210] sm:$0xff] }
  0xce   : > { %3045 = vmatprep.subr.bf16.mxu0 %v3044_v36  ;;  %v1242_v51 = vld [vmem:[#allocation7 + $0x40] sm:$0xff]  ;;  %v3034_v36 = vpack.c.bf16 %v1247_v23, %v1246_v20  ;;  %v1301_v8 = vld [vmem:[#allocation7 + $0x218] sm:$0xff]  ;;  %v1303_v23 = vld [vmem:[#allocation7 + $0x228] sm:$0xff] }
  0xcf   : > { %3009 = vmatprep.subr.bf16.mxu1 %v3008_v42  ;;  %v3026_v42 = vpack.c.bf16 %v1243_v12, %v1242_v51  ;;  %v1314_v51 = vld [vmem:[#allocation7 + $0x280] sm:$0xff]  ;;  %v1315_v12 = vld [vmem:[#allocation7 + $0x288] sm:$0xff] }
  0xd0   : > { %2796 = vmatmul.mubr.msk.f32.gmra.mrb[34].mxu0 %vm3781_vm9, %v3852_v13  ;;  %v3010_v13 = vpack.c.bf16 %v1235_v9, %v1234_v44  ;;  %v1288_v44 = vld [vmem:[#allocation7 + $0x1b0] sm:$0xff]  ;;  %v1289_v9 = vld [vmem:[#allocation7 + $0x1b8] sm:$0xff]  ;;  %v1302_v20 = vld [vmem:[#allocation7 + $0x220] sm:$0xff] }
  0xd1   : > { %2798 = vmatprep.mubr.msk.f32.mxu0 %vm3814_vm11, %v3879_v35  ;;  %v3012_v35 = vpack.c.bf16 %v1253_v41, %v1252_v33  ;;  %3047 = vmatpush3.bf16.msra.mxu0 %v3046_v45  ;;  %v1272_v33 = vld [vmem:[#allocation7 + $0x130] sm:$0xff]  ;;  %v1273_v41 = vld [vmem:[#allocation7 + $0x138] sm:$0xff]  ;;  %v3060_v45 = vpack.c.bf16 %v1293_v38, %v1292_v27 }
  0xd2   : > { %3011 = vmatpush3.bf16.msra.mxu1 %v3010_v13  ;;  %3049 = vmatprep.subr.bf16.mxu0 %v3048_v56  ;;  %v3052_v13 = vpack.c.bf16 %v1289_v9, %v1288_v44  ;;  %v3038_v56 = vpack.c.bf16 %v1249_v62, %v1248_v2  ;;  %v1296_v44 = vld [vmem:[#allocation7 + $0x1f0] sm:$0xff]  ;;  %v1297_v9 = vld [vmem:[#allocation7 + $0x1f8] sm:$0xff]  ;;  %v1306_v2 = vld [vmem:[#allocation7 + $0x240] sm:$0xff] }
  0xd3   : > { %3013 = vmatprep.subr.bf16.mxu1 %v3012_v35  ;;  %v3054_v35 = vpack.c.bf16 %v1273_v41, %v1272_v33  ;;  %v3068_v33 = vpack.c.bf16 %v1297_v9, %v1296_v44  ;;  %v1299_v41 = vld [vmem:[#allocation7 + $0x208] sm:$0xff]  ;;  %v1320_v27 = vld [vmem:[#allocation7 + $0x2b0] sm:$0xff]  ;;  %v1321_v38 = vld [vmem:[#allocation7 + $0x2b8] sm:$0xff] }
  0xd4   : > { %2799 = vmatmul.mubr.msk.f32.gmra.mrb[36].mxu0 %vm3847_vm13, %v3908_v5  ;;  %v1255_v5 = vld [vmem:[#allocation7 + $0xa8] sm:$0xff]  ;;  %v1310_v44 = vld [vmem:[#allocation7 + $0x260] sm:$0xff] }
  0xd5   : > { %2801 = vmatprep.mubr.msk.f32.mxu0 %vm3874_vm15, %v665_v58  ;;  %v3016_v21 = vpack.c.bf16 %v1255_v5, %v1254_v17  ;;  %v1259_v58 = vld [vmem:[#allocation7 + $0xc8] sm:$0xff]  ;;  %3051 = vmatpush3.bf16.msra.mxu0 %v3050_v57  ;;  %v1274_v17 = vld [vmem:[#allocation7 + $0x140] sm:$0xff]  ;;  %v3064_v57 = vpack.c.bf16 %v1295_v31, %v1294_v24  ;;  %v1324_v24 = vld [vmem:[#allocation7 + $0x2d0] sm:$0xff] }
  0xd6   : > { %3015 = vmatpush3.bf16.msra.mxu1 %v3014_v63  ;;  %v3024_v10 = vpack.c.bf16 %v1259_v58, %v1258_v49  ;;  %3053 = vmatprep.subr.bf16.mxu0 %v3052_v13  ;;  %v3028_v63 = vpack.c.bf16 %v1261_v59, %v1260_v55  ;;  %v1275_v5 = vld [vmem:[#allocation7 + $0x148] sm:$0xff]  ;;  %v1278_v49 = vld [vmem:[#allocation7 + $0x160] sm:$0xff]  ;;  %v1281_v55 = vld [vmem:[#allocation7 + $0x178] sm:$0xff] }
  0xd7   : > { %3017 = vmatprep.subr.bf16.mxu1 %v3016_v21  ;;  %v3058_v21 = vpack.c.bf16 %v1275_v5, %v1274_v17  ;;  %v1279_v58 = vld [vmem:[#allocation7 + $0x168] sm:$0xff]  ;;  %v1298_v13 = vld [vmem:[#allocation7 + $0x200] sm:$0xff]  ;;  %v3078_v17 = vpack.c.bf16 %v1301_v8, %v1300_v7  ;;  %v1325_v31 = vld [vmem:[#allocation7 + $0x2d8] sm:$0xff] }
  0xd8   : > { %2802 = vmatmul.mubr.msk.f32.gmra.mrb[38].mxu0 %vm3901_vm14, %v3673_v47  ;;  %v3074_v59 = vpack.c.bf16 %v1299_v41, %v1298_v13  ;;  %v1347_v5 = vld [vmem:[#allocation7 + $0x388] sm:$0xff]  ;;  %v1329_v41 = vld [vmem:[#allocation7 + $0x2f8] sm:$0xff]  ;;  %v2159_v8 = vld [vmem:[%s4350_s2] ss:$0 sm:$0xff] }
  0xd9   : > { %3055 = vmatpush3.bf16.msra.mxu0 %v3054_v35  ;;  %v1280_v35 = vld [vmem:[#allocation7 + $0x170] sm:$0xff]  ;;  %v1307_v62 = vld [vmem:[#allocation7 + $0x248] sm:$0xff]  ;;  %vm4415_vm14 = vmmov %vm4414_vm12 }
  0xda   : > { %3019 = vmatpush3.bf16.msra.mxu1 %v3018_v34  ;;  %3057 = vmatprep.subr.bf16.mxu0 %v3056_v16  ;;  %v3032_v34 = vpack.c.bf16 %v1263_v32, %v1262_v28  ;;  %v1346_v16 = vld [vmem:[#allocation7 + $0x380] sm:$0xff]  ;;  %v1319_v32 = vld [vmem:[#allocation7 + $0x2a8] sm:$0xff]  ;;  %vm4416_vm15 = vmmov %vm4412_vm0 }
  0xdb   : > { %3021 = vmatprep.subr.bf16.mxu1 %v3020_v37  ;;  %v3062_v37 = vpack.c.bf16 %v1277_v15, %v1276_v26  ;;  %v1318_v28 = vld [vmem:[#allocation7 + $0x2a0] sm:$0xff]  ;;  %v1304_v26 = vld [vmem:[#allocation7 + $0x230] sm:$0xff]  ;;  %v1305_v15 = vld [vmem:[#allocation7 + $0x238] sm:$0xff] }
  0xdc   : > { %v1311_v9 = vld [vmem:[#allocation7 + $0x268] sm:$0xff] }
  0xdd   : > { %3059 = vmatpush3.bf16.msra.mxu0 %v3058_v21  ;;  %v3104_v21 = vpack.c.bf16 %v1347_v5, %v1346_v16  ;;  %v3098_v13 = vpack.c.bf16 %v1311_v9, %v1310_v44 }
  0xde   : > { %3023 = vmatpush3.bf16.msra.mxu1 %v3022_v48  ;;  %3061 = vmatprep.subr.bf16.mxu0 %v3060_v45  ;;  %v3036_v48 = vpack.c.bf16 %v1265_v40, %v1264_v46  ;;  %v3084_v45 = vpack.c.bf16 %v1321_v38, %v1320_v27  ;;  %v1322_v46 = vld [vmem:[#allocation7 + $0x2c0] sm:$0xff]  ;;  %v1323_v40 = vld [vmem:[#allocation7 + $0x2c8] sm:$0xff] }
  0xdf   : > { %3025 = vmatprep.subr.bf16.mxu1 %v3024_v10  ;;  %v3066_v10 = vpack.c.bf16 %v1279_v58, %v1278_v49  ;;  %v1308_v49 = vld [vmem:[#allocation7 + $0x250] sm:$0xff]  ;;  %v1309_v58 = vld [vmem:[#allocation7 + $0x258] sm:$0xff] }
  0xe1   : > { %3063 = vmatpush3.bf16.msra.mxu0 %v3062_v37  ;;  %v3086_v37 = vpack.c.bf16 %v1305_v15, %v1304_v26 }
  0xe2   : > { %3027 = vmatpush3.bf16.msra.mxu1 %v3026_v42  ;;  %3065 = vmatprep.subr.bf16.mxu0 %v3064_v57  ;;  %v3072_v42 = vpack.c.bf16 %v1315_v12, %v1314_v51  ;;  %v3092_v57 = vpack.c.bf16 %v1325_v31, %v1324_v24  ;;  %v1326_v51 = vld [vmem:[#allocation7 + $0x2e0] sm:$0xff]  ;;  %v1327_v12 = vld [vmem:[#allocation7 + $0x2e8] sm:$0xff] }
  0xe3   : > { %3029 = vmatprep.subr.bf16.mxu1 %v3028_v63  ;;  %v3070_v63 = vpack.c.bf16 %v1281_v55, %v1280_v35  ;;  %v1312_v55 = vld [vmem:[#allocation7 + $0x270] sm:$0xff] }
  0xe5   : > { %3067 = vmatpush3.bf16.msra.mxu0 %v3066_v10  ;;  %v3094_v10 = vpack.c.bf16 %v1309_v58, %v1308_v49 }
  0xe6   : > { %3031 = vmatpush3.bf16.msra.mxu1 %v3030_v60  ;;  %3069 = vmatprep.subr.bf16.mxu0 %v3068_v33  ;;  %v3076_v60 = vpack.c.bf16 %v1317_v1, %v1316_v4  ;;  %v1328_v33 = vld [vmem:[#allocation7 + $0x2f0] sm:$0xff]  ;;  %v1362_v4 = vld [vmem:[#allocation7 + $0x400] sm:$0xff]  ;;  %v1363_v1 = vld [vmem:[#allocation7 + $0x408] sm:$0xff] }
  0xe7   : > { %3033 = vmatprep.subr.bf16.mxu1 %v3032_v34  ;;  %v3080_v34 = vpack.c.bf16 %v1319_v32, %v1318_v28  ;;  %v3100_v35 = vpack.c.bf16 %v1329_v41, %v1328_v33 }
  0xe9   : > { %3071 = vmatpush3.bf16.msra.mxu0 %v3070_v63 }
  0xea   : > { %3035 = vmatpush3.bf16.msra.mxu1 %v3034_v36  ;;  %3105 = vmatprep.subr.bf16.mxu0 %v3104_v21  ;;  %v3082_v36 = vpack.c.bf16 %v1303_v23, %v1302_v20 }
  0xeb   : > { %3037 = vmatprep.subr.bf16.mxu1 %v3036_v48  ;;  %v3088_v48 = vpack.c.bf16 %v1323_v40, %v1322_v46 }
  0xee   : > { %3039 = vmatpush3.bf16.msra.mxu1 %v3038_v56  ;;  %v3090_v56 = vpack.c.bf16 %v1307_v62, %v1306_v2 }
  0xef   : > { %3073 = vmatprep.subr.bf16.mxu1 %v3072_v42  ;;  %v3096_v42 = vpack.c.bf16 %v1327_v12, %v1326_v51 }
  0xf1   : > { %2209 = vmatmul.mubr.msk.f32.vlgmr.msra.gmra.mrb[32].mxu1 %vm3654_vm1, %v3647_v22 }
  0xf2   : > { %3075 = vmatpush3.bf16.msra.mxu1 %v3074_v59  ;;  %v1313_v59 = vld [vmem:[#allocation7 + $0x278] sm:$0xff] }
  0xf3   : > { %3077 = vmatprep.subr.bf16.mxu1 %v3076_v60  ;;  %v3102_v63 = vpack.c.bf16 %v1313_v59, %v1312_v55  ;;  %v4016_v60 = vpack.c.bf16 %v1363_v1, %v1362_v4 }
  0xf6   : > { %3079 = vmatpush3.bf16.msra.mxu1 %v3078_v17 }
  0xf7   : > { %3081 = vmatprep.subr.bf16.mxu1 %v3080_v34 }
  0xfa   : > { %3083 = vmatpush3.bf16.msra.mxu1 %v3082_v36 }
  0xfb   : > { %3085 = vmatprep.subr.bf16.mxu1 %v3084_v45 }
  0xfe   : > { %3087 = vmatpush3.bf16.msra.mxu1 %v3086_v37 }
  0xff   : > { %3089 = vmatprep.subr.bf16.mxu1 %v3088_v48 }
 0x102   : > { %3091 = vmatpush3.bf16.msra.mxu1 %v3090_v56 }
 0x103   : > { %3093 = vmatprep.subr.bf16.mxu1 %v3092_v57 }
 0x106   : > { %3095 = vmatpush3.bf16.msra.mxu1 %v3094_v10 }
 0x107   : > { %3097 = vmatprep.subr.bf16.mxu1 %v3096_v42 }
 0x10a   : > { %3099 = vmatpush3.bf16.msra.mxu1 %v3098_v13 }
 0x10b   : > { %3101 = vmatprep.subr.bf16.mxu1 %v3100_v35 }
 0x10e   : > { %3103 = vmatpush3.bf16.msra.mxu1 %v3102_v63 }
 0x10f   : > { %3137 = vmatprep.subr.bf16.mxu1 %v4016_v60 }
 0x15f   : > { %v2296_v7 = vpop.f32.mrb[0].mxu0 }
 0x160   : > { %v2297_v16 = vpop.f32.mrb[1].mxu0 }
 0x161   : > { %v2352_v17 = vpop.f32.mrb[0].mxu1  ;;  %v2298_v5 = vadd.f32 %v2297_v16, %v2296_v7 }
 0x162   : > { %v2353_v21 = vpop.f32.mrb[1].mxu1 }
 0x163   : > { %v2354_v28 = vadd.f32 %v2353_v21, %v2352_v17  ;;  %v768_v32 = vadd.f32 %v2298_v5, %v2159_v8  ;;  %v2299_v34 = vpop.f32.mrb[2].mxu0 }
 0x164   : > { %v2300_v20 = vpop.f32.mrb[3].mxu0 }
 0x165   : > { %v2355_v23 = vpop.f32.mrb[2].mxu1  ;;  %v873_v36 = vadd.f32 %v2354_v28, %v768_v32  ;;  %v2301_v27 = vadd.f32 %v2300_v20, %v2299_v34 }
 0x166   : > { %v2356_v38 = vpop.f32.mrb[3].mxu1 }
 0x167   : > { %v2357_v45 = vadd.f32 %v2356_v38, %v2355_v23  ;;  %v773_v26 = vadd.f32 %v2301_v27, %v2159_v8  ;;  %v2302_v15 = vpop.f32.mrb[4].mxu0 }
 0x168   : > { %v2303_v37 = vpop.f32.mrb[5].mxu0 }
 0x169   : > { %v2358_v46 = vpop.f32.mrb[4].mxu1  ;;  %v878_v40 = vadd.f32 %v2357_v45, %v773_v26  ;;  %v2304_v48 = vadd.f32 %v2303_v37, %v2302_v15 }
 0x16a   : > { %v2359_v2 = vpop.f32.mrb[5].mxu1 }
 0x16b   : > { %v2360_v62 = vadd.f32 %v2359_v2, %v2358_v46  ;;  %v778_v56 = vadd.f32 %v2304_v48, %v2159_v8  ;;  %v2305_v24 = vpop.f32.mrb[6].mxu0 }
 0x16c   : > { %v2306_v31 = vpop.f32.mrb[7].mxu0 }
 0x16d   : > { %v2361_v57 = vpop.f32.mrb[6].mxu1  ;;  %v883_v49 = vadd.f32 %v2360_v62, %v778_v56  ;;  %v2307_v58 = vadd.f32 %v2306_v31, %v2305_v24 }
 0x16e   : > { %v2362_v10 = vpop.f32.mrb[7].mxu1 }
 0x16f   : > { %v2363_v51 = vadd.f32 %v2362_v10, %v2361_v57  ;;  %v783_v12 = vadd.f32 %v2307_v58, %v2159_v8  ;;  %v2308_v42 = vpop.f32.mrb[8].mxu0 }
 0x170   : > { %v2309_v44 = vpop.f32.mrb[9].mxu0 }
 0x171   : > { %v2364_v9 = vpop.f32.mrb[8].mxu1  ;;  %v888_v13 = vadd.f32 %v2363_v51, %v783_v12  ;;  %v2310_v33 = vadd.f32 %v2309_v44, %v2308_v42 }
 0x172   : > { %v2365_v41 = vpop.f32.mrb[9].mxu1 }
 0x173   : > { %v2366_v35 = vadd.f32 %v2365_v41, %v2364_v9  ;;  %v788_v55 = vadd.f32 %v2310_v33, %v2159_v8  ;;  %v2311_v59 = vpop.f32.mrb[10].mxu0 }
 0x174   : > { %v2312_v63 = vpop.f32.mrb[11].mxu0 }
 0x175   : > { %v2367_v4 = vpop.f32.mrb[10].mxu1  ;;  %v893_v1 = vadd.f32 %v2366_v35, %v788_v55  ;;  %v2313_v7 = vadd.f32 %v2312_v63, %v2311_v59 }
 0x176   : > { %v2368_v16 = vpop.f32.mrb[11].mxu1 }
 0x177   : > { %v2369_v17 = vadd.f32 %v2368_v16, %v2367_v4  ;;  %v793_v5 = vadd.f32 %v2313_v7, %v2159_v8  ;;  %v2314_v21 = vpop.f32.mrb[12].mxu0 }
 0x178   : > { %v2315_v28 = vpop.f32.mrb[13].mxu0 }
 0x179   : > { %v2370_v32 = vpop.f32.mrb[12].mxu1  ;;  %v898_v34 = vadd.f32 %v2369_v17, %v793_v5  ;;  %v2316_v20 = vadd.f32 %v2315_v28, %v2314_v21 }
 0x17a   : > { %v2371_v23 = vpop.f32.mrb[13].mxu1 }
 0x17b   : > { %v2372_v27 = vadd.f32 %v2371_v23, %v2370_v32  ;;  %v798_v38 = vadd.f32 %v2316_v20, %v2159_v8  ;;  %v2317_v45 = vpop.f32.mrb[14].mxu0 }
 0x17c   : > { %v2318_v26 = vpop.f32.mrb[15].mxu0 }
 0x17d   : > { %v2373_v15 = vpop.f32.mrb[14].mxu1  ;;  %v903_v37 = vadd.f32 %v2372_v27, %v798_v38  ;;  %v2319_v46 = vadd.f32 %v2318_v26, %v2317_v45 }
 0x17e   : > { %v2374_v48 = vpop.f32.mrb[15].mxu1 }
 0x17f   : > { %v2375_v2 = vadd.f32 %v2374_v48, %v2373_v15  ;;  %v803_v62 = vadd.f32 %v2319_v46, %v2159_v8  ;;  %v2408_v56 = vpop.f32.mrb[16].mxu0 }
 0x180   : > { %v2409_v24 = vpop.f32.mrb[17].mxu0 }
 0x181   : > { %v2464_v31 = vpop.f32.mrb[16].mxu1  ;;  %v908_v57 = vadd.f32 %v2375_v2, %v803_v62  ;;  %v2410_v58 = vadd.f32 %v2409_v24, %v2408_v56 }
 0x182   : > { %v2465_v10 = vpop.f32.mrb[17].mxu1 }
 0x183   : > { %v2466_v51 = vadd.f32 %v2465_v10, %v2464_v31  ;;  %v978_v12 = vadd.f32 %v2410_v58, %v873_v36  ;;  %v2411_v42 = vpop.f32.mrb[18].mxu0 }
 0x184   : > { %v2412_v44 = vpop.f32.mrb[19].mxu0 }
 0x185   : > { %v2467_v9 = vpop.f32.mrb[18].mxu1  ;;  %v2413_v33 = vadd.f32 %v2412_v44, %v2411_v42  ;;  %v1083_v35 = vadd.f32 %v2466_v51, %v978_v12 }
 0x186   : > { %v2468_v41 = vpop.f32.mrb[19].mxu1 }
 0x187   : > { %v2469_v55 = vadd.f32 %v2468_v41, %v2467_v9  ;;  %v983_v59 = vadd.f32 %v2413_v33, %v878_v40  ;;  %v2414_v63 = vpop.f32.mrb[20].mxu0 }
 0x188   : > { %v2415_v4 = vpop.f32.mrb[21].mxu0 }
 0x189   : > { %v2470_v7 = vpop.f32.mrb[20].mxu1  ;;  %v2416_v8 = vadd.f32 %v2415_v4, %v2414_v63  ;;  %v1088_v17 = vadd.f32 %v2469_v55, %v983_v59 }
 0x18a   : > { %v2471_v16 = vpop.f32.mrb[21].mxu1 }
 0x18b   : > { %v2472_v5 = vadd.f32 %v2471_v16, %v2470_v7  ;;  %v988_v21 = vadd.f32 %v2416_v8, %v883_v49  ;;  %v2417_v28 = vpop.f32.mrb[22].mxu0 }
 0x18c   : > { %v2418_v32 = vpop.f32.mrb[23].mxu0 }
 0x18d   : > { %v2473_v20 = vpop.f32.mrb[22].mxu1  ;;  %v2419_v36 = vadd.f32 %v2418_v32, %v2417_v28  ;;  %v1093_v27 = vadd.f32 %v2472_v5, %v988_v21 }
 0x18e   : > { %v2474_v23 = vpop.f32.mrb[23].mxu1 }
 0x18f   : > { %v2475_v38 = vadd.f32 %v2474_v23, %v2473_v20  ;;  %v993_v45 = vadd.f32 %v2419_v36, %v888_v13  ;;  %v2420_v26 = vpop.f32.mrb[24].mxu0 }
 0x190   : > { %v2421_v15 = vpop.f32.mrb[25].mxu0 }
 0x191   : > { %v2476_v46 = vpop.f32.mrb[24].mxu1  ;;  %v2422_v40 = vadd.f32 %v2421_v15, %v2420_v26  ;;  %v1098_v2 = vadd.f32 %v2475_v38, %v993_v45  ;;  %v1330_v45 = vld [vmem:[#allocation7 + $0x300] sm:$0xff]  ;;  %v1331_v15 = vld [vmem:[#allocation7 + $0x308] sm:$0xff] }
 0x192   : > { %v2477_v48 = vpop.f32.mrb[25].mxu1 }
 0x193   : > { %v2478_v62 = vadd.f32 %v2477_v48, %v2476_v46  ;;  %v998_v56 = vadd.f32 %v2422_v40, %v893_v1  ;;  %v2423_v24 = vpop.f32.mrb[26].mxu0  ;;  %v1348_v46 = vld [vmem:[#allocation7 + $0x390] sm:$0xff]  ;;  %v1349_v40 = vld [vmem:[#allocation7 + $0x398] sm:$0xff] }
 0x194   : > { %v2424_v31 = vpop.f32.mrb[27].mxu0 }
 0x195   : > { %v2479_v58 = vpop.f32.mrb[26].mxu1  ;;  %v2425_v49 = vadd.f32 %v2424_v31, %v2423_v24  ;;  %v1103_v51 = vadd.f32 %v2478_v62, %v998_v56 }
 0x196   : > { %v2480_v10 = vpop.f32.mrb[27].mxu1 }
 0x197   : > { %v2481_v12 = vadd.f32 %v2480_v10, %v2479_v58  ;;  %v1003_v42 = vadd.f32 %v2425_v49, %v898_v34  ;;  %v2426_v44 = vpop.f32.mrb[28].mxu0  ;;  %v3106_v58 = vpack.c.bf16 %v1331_v15, %v1330_v45  ;;  %v3108_v49 = vpack.c.bf16 %v1349_v40, %v1348_v46  ;;  %v1332_v10 = vld [vmem:[#allocation7 + $0x310] sm:$0xff]  ;;  %v1353_v46 = vld [vmem:[#allocation7 + $0x3b8] sm:$0xff] }
 0x198   : > { %v2427_v9 = vpop.f32.mrb[29].mxu0  ;;  %v1352_v15 = vld [vmem:[#allocation7 + $0x3b0] sm:$0xff] }
 0x199   : > { %v2482_v33 = vpop.f32.mrb[28].mxu1  ;;  %v2428_v13 = vadd.f32 %v2427_v9, %v2426_v44  ;;  %v1108_v55 = vadd.f32 %v2481_v12, %v1003_v42  ;;  %v1333_v9 = vld [vmem:[#allocation7 + $0x318] sm:$0xff] }
 0x19a   : > { %v2483_v41 = vpop.f32.mrb[29].mxu1 }
 0x19b   : > { %v2484_v59 = vadd.f32 %v2483_v41, %v2482_v33  ;;  %v1008_v63 = vadd.f32 %v2428_v13, %v903_v37  ;;  %v2429_v4 = vpop.f32.mrb[30].mxu0  ;;  %v1350_v33 = vld [vmem:[#allocation7 + $0x3a0] sm:$0xff]  ;;  %v1351_v13 = vld [vmem:[#allocation7 + $0x3a8] sm:$0xff] }
 0x19c   : > { %v2430_v7 = vpop.f32.mrb[31].mxu0 }
 0x19d   : > { %v2485_v8 = vpop.f32.mrb[30].mxu1  ;;  %v2431_v1 = vadd.f32 %v2430_v7, %v2429_v4  ;;  %v4022_v5 = vadd.f32 %v2484_v59, %v1008_v63 }
 0x19e   : > { %v2486_v16 = vpop.f32.mrb[31].mxu1 }
 0x19f   : > { %v2487_v21 = vadd.f32 %v2486_v16, %v2485_v8  ;;  %v1013_v28 = vadd.f32 %v2431_v1, %v908_v57  ;;  %v2794_v32 = vpop.f32.mrb[32].mxu0 }
 0x1a0   : > { %v1193_v20 = vadd.f32 %v2794_v32, %v1088_v17  ;;  %v1187_v34 = vpop.f32.mrb[33].mxu0  ;;  %v1334_v32 = vld [vmem:[#allocation7 + $0x320] sm:$0xff] }
 0x1a1   : > { %v1188_v36 = vadd.f32 %v1187_v34, %v1083_v35  ;;  %v1118_v23 = vadd.f32 %v2487_v21, %v1013_v28  ;;  %v3110_v21 = vpack.c.bf16 %v1333_v9, %v1332_v10  ;;  %v3112_v28 = vpack.c.bf16 %v1351_v13, %v1350_v33  ;;  %v1354_v9 = vld [vmem:[#allocation7 + $0x3c0] sm:$0xff]  ;;  %v1355_v33 = vld [vmem:[#allocation7 + $0x3c8] sm:$0xff] }
 0x1a2   : > { %v4024_v38 = vmax.f32 %v1193_v20, 0.0 }
 0x1a3   : > { %v4026_v26 = vmax.f32 %v1188_v36, 0.0  ;;  %v2797_v37 = vpop.f32.mrb[34].mxu0 }
 0x1a4   : > { %v1203_v48 = vadd.f32 %v2797_v37, %v1098_v2  ;;  %v1197_v62 = vpop.f32.mrb[35].mxu0  ;;  %v1388_v56 = vrot.slane %v4024_v38, 7  ;;  %v1417_v57 = vrot.slane %v4024_v38, 1  ;;  %v1335_v37 = vld [vmem:[#allocation7 + $0x328] sm:$0xff] }
 0x1a5   : > { %v1415_v17 = vrot.slane %v4026_v26, 1  ;;  %v1198_v24 = vadd.f32 %v1197_v62, %v1093_v27  ;;  %1560 = vmatprep.mubr.f32.mxu1 %v4026_v26  ;;  %v1386_v35 = vrot.slane %v4026_v26, 7 }
 0x1a6   : > { %v4033_v31 = vmax.f32 %v1203_v48, 0.0 }
 0x1a7   : > { %v4035_v12 = vmax.f32 %v1198_v24, 0.0  ;;  %v2800_v2 = vpop.f32.mrb[36].mxu0  ;;  %v1387_v42 = vsel %vm4414_vm12, %v3647_v22, %v1386_v35  ;;  %v1416_v44 = vsel %vm4412_vm0, %v3673_v47, %v1415_v17  ;;  %v4042_v27 = vsel %vm4415_vm14, %v1386_v35, %v1388_v56  ;;  %vm4417_vm14 = vmmov %vm4414_vm12 }
 0x1a8   : > { %v1213_v41 = vadd.f32 %v2800_v2, %v1108_v55  ;;  %v1207_v59 = vpop.f32.mrb[37].mxu0  ;;  %2210 = vmatmul.mubr.msk.f32.gmra.mrb[34].mxu1 %vm3699_vm4, %v1387_v42  ;;  %2217 = vmatprep.mubr.msk.f32.mxu0 %vm3654_vm1, %v1387_v42  ;;  %v4049_v63 = vsel %vm4416_vm15, %v1415_v17, %v1417_v57  ;;  %v1392_v4 = vrot.slane %v4033_v31, 7  ;;  %v1421_v7 = vrot.slane %v4033_v31, 1  ;;  %vm4418_vm15 = vmmov %vm4412_vm0  ;;  %v1337_v42 = vld [vmem:[#allocation7 + $0x338] sm:$0xff] }
 0x1a9   : > { %v1208_v8 = vadd.f32 %v1207_v59, %v1103_v51  ;;  %1565 = vmatprep.mubr.f32.mxu1 %v4024_v38  ;;  %2218 = vmatmul.mubr.msk.f32.vlgmr.msra.gmra.mrb[40].mxu0 %vm3685_vm3, %v1416_v44  ;;  %v1390_v55 = vrot.slane %v4035_v12, 7  ;;  %v1419_v1 = vrot.slane %v4035_v12, 1 }
 0x1aa   : > { %v4058_v16 = vmax.f32 %v1213_v41, 0.0  ;;  %2219 = vmatprep.mubr.msk.f32.mxu0 %vm3699_vm4, %v4042_v27  ;;  %3107 = vmatpush3.bf16.msra.mxu0 %v3106_v58  ;;  %v3114_v58 = vpack.c.bf16 %v1335_v37, %v1334_v32 }
 0x1ab   : > { %v4063_v51 = vmax.f32 %v1208_v8, 0.0  ;;  %v2803_v20 = vpop.f32.mrb[38].mxu0  ;;  %3109 = vmatprep.subr.bf16.mxu0 %v3108_v49  ;;  %v4066_v34 = vsel %vm4417_vm14, %v1388_v56, %v1390_v55  ;;  %v4069_v36 = vsel %vm4418_vm15, %v1417_v57, %v1419_v1  ;;  %v4072_v45 = vsel %vm4414_vm12, %v1390_v55, %v1392_v4  ;;  %vm4419_vm14 = vmmov %vm4414_vm12 }
 0x1ac   : > { %v1223_v40 = vadd.f32 %v2803_v20, %v1118_v23  ;;  %v1217_v48 = vpop.f32.mrb[39].mxu0  ;;  %2211 = vmatmul.mubr.msk.f32.gmra.mrb[36].mxu1 %vm3733_vm6, %v4042_v27  ;;  %v4078_v62 = vsel %vm4412_vm0, %v1419_v1, %v1421_v7  ;;  %v1396_v56 = vrot.slane %v4058_v16, 7  ;;  %v1425_v57 = vrot.slane %v4058_v16, 1  ;;  %vm4420_vm15 = vmmov %vm4412_vm0 }
 0x1ad   : > { %v1218_v17 = vadd.f32 %v1217_v48, %v4022_v5  ;;  %1570 = vmatprep.mubr.f32.mxu1 %v4035_v12  ;;  %2220 = vmatmul.mubr.msk.f32.gmra.mrb[42].mxu0 %vm3715_vm5, %v4049_v63  ;;  %v1394_v23 = vrot.slane %v4063_v51, 7  ;;  %v1423_v24 = vrot.slane %v4063_v51, 1  ;;  %v3116_v49 = vpack.c.bf16 %v1353_v46, %v1352_v15  ;;  %v1336_v5 = vld [vmem:[#allocation7 + $0x330] sm:$0xff] }
 0x1ae   : > { %v4089_v35 = vmax.f32 %v1223_v40, 0.0  ;;  %2221 = vmatprep.mubr.msk.f32.mxu0 %vm3733_vm6, %v4066_v34  ;;  %3111 = vmatpush3.bf16.msra.mxu0 %v3110_v21  ;;  %v3118_v55 = vpack.c.bf16 %v1337_v42, %v1336_v5  ;;  %v3120_v1 = vpack.c.bf16 %v1355_v33, %v1354_v9  ;;  %v1338_v21 = vld [vmem:[#allocation7 + $0x340] sm:$0xff]  ;;  %v1356_v46 = vld [vmem:[#allocation7 + $0x3d0] sm:$0xff]  ;;  %v1357_v40 = vld [vmem:[#allocation7 + $0x3d8] sm:$0xff] }
 0x1af   : > { %v4094_v10 = vmax.f32 %v1218_v17, 0.0  ;;  %3113 = vmatprep.subr.bf16.mxu0 %v3112_v28  ;;  %v4097_v2 = vsel %vm4419_vm14, %v1392_v4, %v1394_v23  ;;  %v4100_v44 = vsel %vm4420_vm15, %v1421_v7, %v1423_v24  ;;  %v4103_v13 = vsel %vm4414_vm12, %v1394_v23, %v1396_v56  ;;  %v1339_v28 = vld [vmem:[#allocation7 + $0x348] sm:$0xff]  ;;  %vm4421_vm14 = vmmov %vm4414_vm12  ;;  %v1341_v17 = vld [vmem:[#allocation7 + $0x358] sm:$0xff] }
 0x1b0   : > { %2212 = vmatmul.mubr.msk.f32.gmra.mrb[38].mxu1 %vm3766_vm8, %v4066_v34  ;;  %v4109_v41 = vsel %vm4412_vm0, %v1423_v24, %v1425_v57  ;;  %v1447_v59 = vrot.slane %v4089_v35, 7  ;;  %v1429_v4 = vrot.slane %v4089_v35, 1  ;;  %vm4422_vm15 = vmmov %vm4412_vm0  ;;  %v3122_v48 = vpack.c.bf16 %v1339_v28, %v1338_v21  ;;  %v1358_v23 = vld [vmem:[#allocation7 + $0x3e0] sm:$0xff]  ;;  %v1359_v24 = vld [vmem:[#allocation7 + $0x3e8] sm:$0xff] }
 0x1b1   : > { %1575 = vmatprep.mubr.f32.mxu1 %v4033_v31  ;;  %2222 = vmatmul.mubr.msk.f32.gmra.mrb[44].mxu0 %vm3748_vm7, %v4069_v36  ;;  %v1398_v7 = vrot.slane %v4094_v10, 7  ;;  %v1427_v8 = vrot.slane %v4094_v10, 1  ;;  %v1342_v5 = vld [vmem:[#allocation7 + $0x360] sm:$0xff]  ;;  %v1343_v42 = vld [vmem:[#allocation7 + $0x368] sm:$0xff]  ;;  %v1360_v9 = vld [vmem:[#allocation7 + $0x3f0] sm:$0xff] }
 0x1b2   : > { %2223 = vmatprep.mubr.msk.f32.mxu0 %vm3766_vm8, %v4072_v45  ;;  %3115 = vmatpush3.bf16.msra.mxu0 %v3114_v58  ;;  %vm4423_vm8 = vnez %v4397_v30  ;;  %v1361_v33 = vld [vmem:[#allocation7 + $0x3f8] sm:$0xff]  ;;  %v1364_v21 = vld [vmem:[#allocation7 + $0x410] sm:$0xff] }
 0x1b3   : > { %3117 = vmatprep.subr.bf16.mxu0 %v3116_v49  ;;  %v4123_v32 = vsel %vm4421_vm14, %v1396_v56, %v1398_v7  ;;  %v4126_v20 = vsel %vm4422_vm15, %v1425_v57, %v1427_v8  ;;  %v4131_v37 = vsel %vm4414_vm12, %v1398_v7, %v1447_v59  ;;  %v4136_v15 = vsel %vm4412_vm0, %v1427_v8, %v1429_v4  ;;  %v1340_v57 = vld [vmem:[#allocation7 + $0x350] sm:$0xff]  ;;  %v1365_v28 = vld [vmem:[#allocation7 + $0x418] sm:$0xff] }
 0x1b4   : > { %2213 = vmatmul.mubr.msk.f32.gmra.mrb[40].mxu1 %vm4423_vm8, %v4072_v45  ;;  %v3124_v56 = vpack.c.bf16 %v1357_v40, %v1356_v46  ;;  %vm4424_vm14 = vnez %v4401_v53  ;;  %v3126_v58 = vpack.c.bf16 %v1341_v17, %v1340_v57  ;;  %v3128_v49 = vpack.c.bf16 %v1359_v24, %v1358_v23  ;;  %v1369_v57 = vld [vmem:[#allocation7 + $0x438] sm:$0xff]  ;;  %v1370_v17 = vld [vmem:[#allocation7 + $0x440] sm:$0xff]  ;;  %v1371_v23 = vld [vmem:[#allocation7 + $0x448] sm:$0xff] }
 0x1b5   : > { %1580 = vmatprep.mubr.f32.mxu1 %v4063_v51  ;;  %2224 = vmatmul.mubr.msk.f32.gmra.mrb[46].mxu0 %vm3781_vm9, %v4078_v62  ;;  %v3130_v7 = vpack.c.bf16 %v1343_v42, %v1342_v5  ;;  %v3132_v8 = vpack.c.bf16 %v1361_v33, %v1360_v9  ;;  %vm4425_vm15 = vnez %v4407_v54  ;;  %v3140_v40 = vpack.c.bf16 %v1365_v28, %v1364_v21 }
 0x1b6   : > { %2225 = vmatprep.mubr.msk.f32.mxu0 %vm4423_vm8, %v4097_v2  ;;  %3119 = vmatpush3.bf16.msra.mxu0 %v3118_v55  ;;  %v1344_v55 = vld [vmem:[#allocation7 + $0x370] sm:$0xff]  ;;  %vm4426_vm12 = vnez %v4411_v19  ;;  %v3152_v29 = vpack.c.bf16 %v1371_v23, %v1370_v17 }
 0x1b7   : > { %3121 = vmatprep.subr.bf16.mxu0 %v3120_v1  ;;  %v1345_v1 = vld [vmem:[#allocation7 + $0x378] sm:$0xff] }
 0x1b8   : > { %2214 = vmatmul.mubr.msk.f32.gmra.mrb[42].mxu1 %vm4424_vm14, %v4097_v2  ;;  %v3134_v46 = vpack.c.bf16 %v1345_v1, %v1344_v55 }
 0x1b9   : > { %1585 = vmatprep.mubr.f32.mxu1 %v4058_v16  ;;  %2226 = vmatmul.mubr.msk.f32.gmra.mrb[48].mxu0 %vm3814_vm11, %v4100_v44 }
 0x1ba   : > { %2227 = vmatprep.mubr.msk.f32.mxu0 %vm4424_vm14, %v4103_v13  ;;  %3123 = vmatpush3.bf16.msra.mxu0 %v3122_v48  ;;  %v1366_v48 = vld [vmem:[#allocation7 + $0x420] sm:$0xff] }
 0x1bb   : > { %3125 = vmatprep.subr.bf16.mxu0 %v3124_v56  ;;  %v1367_v56 = vld [vmem:[#allocation7 + $0x428] sm:$0xff] }
 0x1bc   : > { %2215 = vmatmul.mubr.msk.f32.gmra.mrb[44].mxu1 %vm4413_vm10, %v4103_v13 }
 0x1bd   : > { %1590 = vmatprep.mubr.f32.mxu1 %v4094_v10  ;;  %2228 = vmatmul.mubr.msk.f32.gmra.mrb[50].mxu0 %vm3847_vm13, %v4109_v41 }
 0x1be   : > { %2229 = vmatprep.mubr.msk.f32.mxu0 %vm4413_vm10, %v4123_v32  ;;  %3127 = vmatpush3.bf16.msra.mxu0 %v3126_v58 }
 0x1bf   : > { %3129 = vmatprep.subr.bf16.mxu0 %v3128_v49 }
 0x1c0   : > { %2216 = vmatmul.mubr.msk.f32.gmra.mrb[46].mxu1 %vm3888_vm2, %v4123_v32 }
 0x1c1   : > { %2230 = vmatmul.mubr.msk.f32.gmra.mrb[52].mxu0 %vm4425_vm15, %v4126_v20  ;;  %2233 = vmatprep.mubr.msk.f32.mxu1 %vm3685_vm3, %v4049_v63  ;;  %v3144_v63 = vpack.c.bf16 %v1367_v56, %v1366_v48 }
 0x1c2   : > { %2231 = vmatprep.mubr.msk.f32.mxu0 %vm3888_vm2, %v4131_v37  ;;  %3131 = vmatpush3.bf16.msra.mxu0 %v3130_v7 }
 0x1c3   : > { %3133 = vmatprep.subr.bf16.mxu0 %v3132_v8 }
 0x1c4   : > { %1766 = vmatmul.mubr.f32.vlgmr.msra.gmra.mrb[48].mxu1 %v4026_v26  ;;  %v1368_v26 = vld [vmem:[#allocation7 + $0x430] sm:$0xff] }
 0x1c5   : > { %2232 = vmatmul.mubr.msk.f32.gmra.mrb[54].mxu0 %vm4426_vm12, %v4136_v15  ;;  %2234 = vmatprep.mubr.msk.f32.mxu1 %vm3715_vm5, %v4069_v36 }
 0x1c6   : > { %3139 = vmatpush3.bf16.msra.mxu1 %v4016_v60  ;;  %3135 = vmatpush3.bf16.msra.mxu0 %v3134_v46  ;;  %v3148_v60 = vpack.c.bf16 %v1369_v57, %v1368_v26 }
 0x1c7   : > { %1870 = vmatprep.mubr.f32.mxu0 %v4024_v38  ;;  %3141 = vmatprep.subr.bf16.mxu1 %v3140_v40 }
 0x1c8   : > { %1771 = vmatmul.mubr.f32.gmra.mrb[50].mxu1 %v4024_v38  ;;  %v1372_v38 = vld [vmem:[#allocation7 + $0x450] sm:$0xff] }
 0x1c9   : > { %2235 = vmatprep.mubr.msk.f32.mxu1 %vm3748_vm7, %v4078_v62  ;;  %2241 = vmatmul.mubr.msk.f32.vlgmr.msra.gmra.mrb[56].mxu0 %vm3654_vm1, %v4042_v27  ;;  %v1373_v27 = vld [vmem:[#allocation7 + $0x458] sm:$0xff]  ;;  %vm4427_vm1 = vnez %v4393_v61 }
 0x1ca   : > { %3143 = vmatpush3.bf16.msra.mxu1 %v3140_v40  ;;  %1875 = vmatprep.mubr.f32.mxu0 %v4035_v12  ;;  %v3156_v14 = vpack.c.bf16 %v1373_v27, %v1372_v38 }
 0x1cb   : > { %3145 = vmatprep.subr.bf16.mxu1 %v3144_v63 }
 0x1cc   : > { %1776 = vmatmul.mubr.f32.gmra.mrb[52].mxu1 %v4035_v12  ;;  %v1374_v12 = vld [vmem:[#allocation7 + $0x460] sm:$0xff] }
 0x1cd   : > { %2236 = vmatprep.mubr.msk.f32.mxu1 %vm3781_vm9, %v4100_v44  ;;  %2242 = vmatmul.mubr.msk.f32.gmra.mrb[58].mxu0 %vm3699_vm4, %v4066_v34  ;;  %v1375_v34 = vld [vmem:[#allocation7 + $0x468] sm:$0xff]  ;;  %vm4428_vm4 = vmmov %vm4412_vm0 }
 0x1ce   : > { %3147 = vmatpush3.bf16.msra.mxu1 %v3144_v63  ;;  %1880 = vmatprep.mubr.f32.mxu0 %v4033_v31  ;;  %v3160_v39 = vpack.c.bf16 %v1375_v34, %v1374_v12 }
 0x1cf   : > { %3149 = vmatprep.subr.bf16.mxu1 %v3148_v60 }
 0x1d0   : > { %1781 = vmatmul.mubr.f32.gmra.mrb[54].mxu1 %v4033_v31  ;;  %v1376_v31 = vld [vmem:[#allocation7 + $0x470] sm:$0xff] }
 0x1d1   : > { %2237 = vmatprep.mubr.msk.f32.mxu1 %vm3814_vm11, %v4109_v41  ;;  %2243 = vmatmul.mubr.msk.f32.gmra.mrb[60].mxu0 %vm3733_vm6, %v4072_v45  ;;  %v1377_v45 = vld [vmem:[#allocation7 + $0x478] sm:$0xff]  ;;  %vm4429_vm6 = vcmask 1040384  }
 0x1d2   : > { %3151 = vmatpush3.bf16.msra.mxu1 %v3148_v60  ;;  %1885 = vmatprep.mubr.f32.mxu0 %v4063_v51  ;;  %v3164_v61 = vpack.c.bf16 %v1377_v45, %v1376_v31  ;;  %v1468_v30 = vsel %vm4429_vm6, %v1447_v59, %v3647_v22 }
 0x1d3   : > { %3153 = vmatprep.subr.bf16.mxu1 %v3152_v29 }
 0x1d4   : > { %1786 = vmatmul.mubr.f32.gmra.mrb[56].mxu1 %v4063_v51 }
 0x1d5   : > { %2238 = vmatprep.mubr.msk.f32.mxu1 %vm3847_vm13, %v4126_v20  ;;  %2244 = vmatmul.mubr.msk.f32.gmra.mrb[62].mxu0 %vm4427_vm1, %v4097_v2 }
 0x1d6   : > { %3155 = vmatpush3.bf16.msra.mxu1 %v3152_v29  ;;  %1890 = vmatprep.mubr.f32.mxu0 %v4058_v16 }
 0x1d7   : > { %3157 = vmatprep.subr.bf16.mxu1 %v3156_v14 }
 0x1d8   : > { %1791 = vmatmul.mubr.f32.gmra.mrb[58].mxu1 %v4058_v16  ;;  %v1458_v16 = vsel %vm4428_vm4, %v1429_v4, %v3673_v47 }
 0x1d9   : > { %2239 = vmatprep.mubr.msk.f32.mxu1 %vm4425_vm15, %v4136_v15  ;;  %2245 = vmatmul.mubr.msk.f32.gmra.mrb[64].mxu0 %vm4423_vm8, %v4103_v13 }
 0x1da   : > { %3159 = vmatpush3.bf16.msra.mxu1 %v3156_v14  ;;  %1895 = vmatprep.mubr.f32.mxu0 %v4094_v10 }
 0x1db   : > { %3161 = vmatprep.subr.bf16.mxu1 %v3160_v39 }
 0x1dc   : > { %1796 = vmatmul.mubr.f32.gmra.mrb[60].mxu1 %v4094_v10 }
 0x1dd   : > { %2240 = vmatprep.mubr.msk.f32.mxu1 %vm4426_vm12, %v1458_v16  ;;  %2246 = vmatmul.mubr.msk.f32.gmra.mrb[66].mxu0 %vm4424_vm14, %v4123_v32 }
 0x1de   : > { %3163 = vmatpush3.bf16.msra.mxu1 %v3160_v39  ;;  %1900 = vmatprep.mubr.f32.mxu0 %v4089_v35 }
 0x1df   : > { %3165 = vmatprep.subr.bf16.mxu1 %v3164_v61 }
 0x1e0   : > { %1801 = vmatmul.mubr.f32.gmra.mrb[62].mxu1 %v4089_v35 }
 0x1e1   : > { %2247 = vmatmul.mubr.msk.f32.gmra.mrb[68].mxu0 %vm4413_vm10, %v4131_v37  ;;  %2836 = vmatprep.mubr.msk.f32.mxu1 %vm3685_vm3, %v4069_v36 }
 0x1e2   : > { %3167 = vmatpush3.bf16.msra.mxu1 %v3164_v61  ;;  %1905 = vmatprep.mubr.f32.mxu0 %v3411_v0  ;;  %v2544_v0 = vpop.f32.mrb[32].mxu1 }
 0x1e3   : > { %v2545_v22 = vpop.f32.mrb[33].mxu1 }
 0x1e4   : > { %v2546_v3 = vadd.f32 %v2545_v22, %v2544_v0 }
 0x1e5   : > { %2837 = vmatmul.mubr.msk.f32.vlgmr.msra.gmra.mrb[64].mxu1 %vm3715_vm5, %v4078_v62  ;;  %2248 = vmatmul.mubr.msk.f32.gmra.mrb[70].mxu0 %vm3888_vm2, %v1468_v30 }
 0x1e6   : > { %2839 = vmatprep.mubr.msk.f32.mxu1 %vm3748_vm7, %v4100_v44  ;;  %v1558_v18 = vadd.f32 %v2546_v3, %v2208_v25 }
 0x1e9   : > { %2840 = vmatmul.mubr.msk.f32.gmra.mrb[66].mxu1 %vm3781_vm9, %v4109_v41 }
 0x1ea   : > { %2842 = vmatprep.mubr.msk.f32.mxu1 %vm3814_vm11, %v4126_v20 }
 0x1ed   : > { %2843 = vmatmul.mubr.msk.f32.gmra.mrb[68].mxu1 %vm3847_vm13, %v4136_v15 }
 0x1ee   : > { %2845 = vmatprep.mubr.msk.f32.mxu1 %vm4425_vm15, %v1458_v16 }
 0x1f1   : > { %2846 = vmatmul.mubr.msk.f32.gmra.mrb[70].mxu1 %vm4426_vm12, %v3673_v47 }
 0x27b   : > { %v2547_v50 = vpop.f32.mrb[34].mxu1 }
 0x27c   : > { %v2548_v11 = vpop.f32.mrb[35].mxu1  ;;  %v2600_v43 = vpop.f32.mrb[40].mxu0 }
 0x27d   : > { %v2549_v53 = vadd.f32 %v2548_v11, %v2547_v50  ;;  %v2601_v6 = vpop.f32.mrb[41].mxu0 }
 0x27e   : > { %v2602_v52 = vadd.f32 %v2601_v6, %v2600_v43 }
 0x27f   : > { %v2550_v54 = vpop.f32.mrb[36].mxu1  ;;  %v1563_v35 = vadd.f32 %v2549_v53, %v2208_v25 }
 0x280   : > { %v1663_v51 = vadd.f32 %v2602_v52, %v1558_v18  ;;  %v2551_v36 = vpop.f32.mrb[37].mxu1  ;;  %v2603_v62 = vpop.f32.mrb[42].mxu0 }
 0x281   : > { %v2552_v19 = vadd.f32 %v2551_v36, %v2550_v54  ;;  %v2604_v47 = vpop.f32.mrb[43].mxu0 }
 0x282   : > { %v2605_v10 = vadd.f32 %v2604_v47, %v2603_v62 }
 0x283   : > { %v2553_v2 = vpop.f32.mrb[38].mxu1  ;;  %v1568_v32 = vadd.f32 %v2552_v19, %v2208_v25 }
 0x284   : > { %v1668_v44 = vadd.f32 %v2605_v10, %v1563_v35  ;;  %v2554_v13 = vpop.f32.mrb[39].mxu1  ;;  %v2606_v41 = vpop.f32.mrb[44].mxu0 }
 0x285   : > { %v2555_v59 = vadd.f32 %v2554_v13, %v2553_v2  ;;  %v2607_v4 = vpop.f32.mrb[45].mxu0 }
 0x286   : > { %v2608_v20 = vadd.f32 %v2607_v4, %v2606_v41 }
 0x287   : > { %v2556_v37 = vpop.f32.mrb[40].mxu1  ;;  %v1573_v42 = vadd.f32 %v2555_v59, %v2208_v25 }
 0x288   : > { %v1673_v15 = vadd.f32 %v2608_v20, %v1568_v32  ;;  %v2557_v24 = vpop.f32.mrb[41].mxu1  ;;  %v2609_v58 = vpop.f32.mrb[46].mxu0 }
 0x289   : > { %v2558_v49 = vadd.f32 %v2557_v24, %v2556_v37  ;;  %v2610_v5 = vpop.f32.mrb[47].mxu0 }
 0x28a   : > { %v2611_v9 = vadd.f32 %v2610_v5, %v2609_v58 }
 0x28b   : > { %v2559_v33 = vpop.f32.mrb[42].mxu1  ;;  %v1578_v28 = vadd.f32 %v2558_v49, %v2208_v25 }
 0x28c   : > { %v1678_v7 = vadd.f32 %v2611_v9, %v1573_v42  ;;  %v2560_v8 = vpop.f32.mrb[43].mxu1  ;;  %v2612_v55 = vpop.f32.mrb[48].mxu0 }
 0x28d   : > { %v2561_v1 = vadd.f32 %v2560_v8, %v2559_v33  ;;  %v2613_v21 = vpop.f32.mrb[49].mxu0 }
 0x28e   : > { %v2614_v46 = vadd.f32 %v2613_v21, %v2612_v55 }
 0x28f   : > { %v2562_v40 = vpop.f32.mrb[44].mxu1  ;;  %v1583_v60 = vadd.f32 %v2561_v1, %v2208_v25 }
 0x290   : > { %v1683_v48 = vadd.f32 %v2614_v46, %v1578_v28  ;;  %v2563_v56 = vpop.f32.mrb[45].mxu1  ;;  %v2615_v63 = vpop.f32.mrb[50].mxu0 }
 0x291   : > { %v2564_v26 = vadd.f32 %v2563_v56, %v2562_v40  ;;  %v2616_v57 = vpop.f32.mrb[51].mxu0 }
 0x292   : > { %v2617_v17 = vadd.f32 %v2616_v57, %v2615_v63 }
 0x293   : > { %v2565_v23 = vpop.f32.mrb[46].mxu1  ;;  %v1588_v34 = vadd.f32 %v2564_v26, %v2208_v25 }
 0x294   : > { %v1688_v29 = vadd.f32 %v2617_v17, %v1583_v60  ;;  %v2566_v38 = vpop.f32.mrb[47].mxu1  ;;  %v2618_v27 = vpop.f32.mrb[52].mxu0 }
 0x295   : > { %v2567_v14 = vadd.f32 %v2566_v38, %v2565_v23  ;;  %v2619_v12 = vpop.f32.mrb[53].mxu0 }
 0x296   : > { %v2620_v39 = vadd.f32 %v2619_v12, %v2618_v27 }
 0x297   : > { %v2656_v31 = vpop.f32.mrb[48].mxu1  ;;  %v1593_v22 = vadd.f32 %v2567_v14, %v2208_v25 }
 0x298   : > { %v1693_v45 = vadd.f32 %v2620_v39, %v1588_v34  ;;  %v2621_v61 = vpop.f32.mrb[54].mxu0  ;;  %v2657_v16 = vpop.f32.mrb[49].mxu1 }
 0x299   : > { %v2658_v30 = vadd.f32 %v2657_v16, %v2656_v31  ;;  %v2622_v0 = vpop.f32.mrb[55].mxu0 }
 0x29a   : > { %v2623_v3 = vadd.f32 %v2622_v0, %v2621_v61 }
 0x29b   : > { %v1768_v50 = vadd.f32 %v2658_v30, %v1663_v51  ;;  %v2659_v11 = vpop.f32.mrb[50].mxu1 }
 0x29c   : > { %v1698_v43 = vadd.f32 %v2623_v3, %v1593_v22  ;;  %v2660_v53 = vpop.f32.mrb[51].mxu1  ;;  %v2712_v6 = vpop.f32.mrb[56].mxu0 }
 0x29d   : > { %v2661_v18 = vadd.f32 %v2660_v53, %v2659_v11  ;;  %v2713_v52 = vpop.f32.mrb[57].mxu0  ;;  %v3240_v11 = vld [vmem:[%s3632_s12 + $0x8] sm:$0xff] }
 0x29e   : > { %v2714_v54 = vadd.f32 %v2713_v52, %v2712_v6  ;;  %v3241_v6 = vld [vmem:[%s3632_s12] sm:$0xff] }
 0x29f   : > { %v1773_v36 = vadd.f32 %v2661_v18, %v1668_v44  ;;  %v2662_v62 = vpop.f32.mrb[52].mxu1 }
 0x2a0   : > { %v2663_v19 = vpop.f32.mrb[53].mxu1  ;;  %v2715_v47 = vpop.f32.mrb[58].mxu0  ;;  %v1873_v35 = vadd.f32 %v2714_v54, %v1768_v50 }
 0x2a1   : > { %v2664_v10 = vadd.f32 %v2663_v19, %v2662_v62  ;;  %v2716_v2 = vpop.f32.mrb[59].mxu0 }
 0x2a2   : > { %v2717_v13 = vadd.f32 %v2716_v2, %v2715_v47  ;;  %v3243_v2 = vld [vmem:[%s3632_s12 + $0x10] sm:$0xff] }
 0x2a3   : > { %v1778_v41 = vadd.f32 %v2664_v10, %v1673_v15  ;;  %v2665_v59 = vpop.f32.mrb[54].mxu1 }
 0x2a4   : > { %v2666_v25 = vpop.f32.mrb[55].mxu1  ;;  %v2718_v4 = vpop.f32.mrb[60].mxu0  ;;  %v1878_v51 = vadd.f32 %v2717_v13, %v1773_v36 }
 0x2a5   : > { %v2667_v32 = vadd.f32 %v2666_v25, %v2665_v59  ;;  %v2719_v20 = vpop.f32.mrb[61].mxu0 }
 0x2a6   : > { %v2720_v37 = vadd.f32 %v2719_v20, %v2718_v4  ;;  %v3244_v20 = vld [vmem:[%s3632_s12 + $0x28] sm:$0xff] }
 0x2a7   : > { %v1783_v24 = vadd.f32 %v2667_v32, %v1678_v7  ;;  %v2668_v58 = vpop.f32.mrb[56].mxu1 }
 0x2a8   : > { %v2669_v49 = vpop.f32.mrb[57].mxu1  ;;  %v2721_v5 = vpop.f32.mrb[62].mxu0  ;;  %v1883_v44 = vadd.f32 %v2720_v37, %v1778_v41 }
 0x2a9   : > { %v2670_v42 = vadd.f32 %v2669_v49, %v2668_v58  ;;  %v2722_v9 = vpop.f32.mrb[63].mxu0 }
 0x2aa   : > { %v2723_v33 = vadd.f32 %v2722_v9, %v2721_v5 }
 0x2ab   : > { %v1788_v8 = vadd.f32 %v2670_v42, %v1683_v48  ;;  %v2671_v55 = vpop.f32.mrb[58].mxu1 }
 0x2ac   : > { %v2672_v1 = vpop.f32.mrb[59].mxu1  ;;  %v2724_v21 = vpop.f32.mrb[64].mxu0  ;;  %v1888_v15 = vadd.f32 %v2723_v33, %v1783_v24  ;;  %v3245_v24 = vld [vmem:[%s3632_s12 + $0x20] sm:$0xff] }
 0x2ad   : > { %v2673_v28 = vadd.f32 %v2672_v1, %v2671_v55  ;;  %v2725_v46 = vpop.f32.mrb[65].mxu0  ;;  %v3247_v1 = vld [vmem:[%s3632_s12 + $0x30] sm:$0xff] }
 0x2ae   : > { %v2726_v40 = vadd.f32 %v2725_v46, %v2724_v21 }
 0x2af   : > { %v1793_v56 = vadd.f32 %v2673_v28, %v1688_v29  ;;  %v2674_v63 = vpop.f32.mrb[60].mxu1 }
 0x2b0   : > { %v2675_v26 = vpop.f32.mrb[61].mxu1  ;;  %v2727_v57 = vpop.f32.mrb[66].mxu0  ;;  %v1893_v7 = vadd.f32 %v2726_v40, %v1788_v8  ;;  %v3246_v8 = vld [vmem:[%s3632_s12 + $0x38] sm:$0xff] }
 0x2b1   : > { %v2676_v60 = vadd.f32 %v2675_v26, %v2674_v63  ;;  %v2728_v17 = vpop.f32.mrb[67].mxu0 }
 0x2b2   : > { %v2729_v23 = vadd.f32 %v2728_v17, %v2727_v57 }
 0x2b3   : > { %v1798_v38 = vadd.f32 %v2676_v60, %v1693_v45  ;;  %v2677_v27 = vpop.f32.mrb[62].mxu1 }
 0x2b4   : > { %v2678_v14 = vpop.f32.mrb[63].mxu1  ;;  %v2730_v48 = vpop.f32.mrb[68].mxu0  ;;  %v1898_v12 = vadd.f32 %v2729_v23, %v1793_v56 }
 0x2b5   : > { %v2679_v34 = vadd.f32 %v2678_v14, %v2677_v27  ;;  %v2731_v39 = vpop.f32.mrb[69].mxu0 }
 0x2b6   : > { %v2732_v31 = vadd.f32 %v2731_v39, %v2730_v48 }
 0x2b7   : > { %v1803_v61 = vadd.f32 %v2679_v34, %v1698_v43 }
 0x2b8   : > { %v2838_v16 = vpop.f32.mrb[64].mxu1  ;;  %v2733_v29 = vpop.f32.mrb[70].mxu0  ;;  %v1903_v30 = vadd.f32 %v2732_v31, %v1798_v38 }
 0x2b9   : > { %v1983_v0 = vadd.f32 %v2838_v16, %v1878_v51  ;;  %v1977_v22 = vpop.f32.mrb[65].mxu1  ;;  %v2734_v3 = vpop.f32.mrb[71].mxu0 }
 0x2ba   : > { %v1978_v50 = vadd.f32 %v1977_v22, %v1873_v35  ;;  %v2735_v45 = vadd.f32 %v2734_v3, %v2733_v29  ;;  %v3242_v35 = vld [vmem:[%s3632_s12 + $0x18] sm:$0xff] }
 0x2bb   : > { %v2017_v53 = vadd.f32 %v3240_v11, %v1983_v0 }
 0x2bc   : > { %v2016_v18 = vadd.f32 %v3241_v6, %v1978_v50  ;;  %v2841_v52 = vpop.f32.mrb[66].mxu1  ;;  %v1908_v54 = vadd.f32 %v2735_v45, %v1803_v61 }
 0x2bd   : > { %v2025_v36 = vmax.f32 %v2017_v53, 0.0  ;;  %v1993_v62 = vadd.f32 %v2841_v52, %v1888_v15  ;;  %v1987_v43 = vpop.f32.mrb[67].mxu1 }
 0x2be   : > { %v2024_v19 = vmax.f32 %v2016_v18, 0.0  ;;  %v1988_v47 = vadd.f32 %v1987_v43, %v1883_v44 }
 0x2bf   : > { %2033 = vst [vmem:[%s4281_s10 + $0x8] sm:$0xff] %v2025_v36  ;;  %v2019_v10 = vadd.f32 %v3242_v35, %v1993_v62 }
 0x2c0   : > { %2032 = vst [vmem:[%s4281_s10] sm:$0xff] %v2024_v19  ;;  %v2018_v13 = vadd.f32 %v3243_v2, %v1988_v47  ;;  %v2844_v41 = vpop.f32.mrb[68].mxu1 }
 0x2c1   : > { %v2027_v59 = vmax.f32 %v2019_v10, 0.0  ;;  %v2003_v25 = vadd.f32 %v2844_v41, %v1898_v12  ;;  %v1997_v4 = vpop.f32.mrb[69].mxu1 }
 0x2c2   : > { %v2026_v51 = vmax.f32 %v2018_v13, 0.0  ;;  %v1998_v32 = vadd.f32 %v1997_v4, %v1893_v7 }
 0x2c3   : > { %2035 = vst [vmem:[%s4281_s10 + $0x18] sm:$0xff] %v2027_v59  ;;  %v2021_v37 = vadd.f32 %v3244_v20, %v2003_v25 }
 0x2c4   : > { %2034 = vst [vmem:[%s4281_s10 + $0x10] sm:$0xff] %v2026_v51  ;;  %v2020_v58 = vadd.f32 %v3245_v24, %v1998_v32  ;;  %v2847_v49 = vpop.f32.mrb[70].mxu1 }
 0x2c5   : > { %v2029_v5 = vmax.f32 %v2021_v37, 0.0  ;;  %v2013_v44 = vadd.f32 %v2847_v49, %v1908_v54  ;;  %v2007_v42 = vpop.f32.mrb[71].mxu1 }
 0x2c6   : > { %v2028_v9 = vmax.f32 %v2020_v58, 0.0  ;;  %v2008_v33 = vadd.f32 %v2007_v42, %v1903_v30 }
 0x2c7   : > { %2037 = vst [vmem:[%s4281_s10 + $0x28] sm:$0xff] %v2029_v5  ;;  %v2023_v55 = vadd.f32 %v3246_v8, %v2013_v44 }
 0x2c8   : > { %2036 = vst [vmem:[%s4281_s10 + $0x20] sm:$0xff] %v2028_v9  ;;  %v2022_v21 = vadd.f32 %v3247_v1, %v2008_v33 }
 0x2c9   : > { %v2031_v15 = vmax.f32 %v2023_v55, 0.0 }
 0x2ca   : > { %v2030_v28 = vmax.f32 %v2022_v21, 0.0 }
 0x2cb   : > { %2039 = vst [vmem:[%s4281_s10 + $0x38] sm:$0xff] %v2031_v15 }
 0x2cc   : > { %2038 = vst [vmem:[%s4281_s10 + $0x30] sm:$0xff] %v2030_v28 }
 0x2cd   : > { %3347 = shalt.err (!%p3344_p1)
}
 0x2ce   : > { %s3348_s12 = scalar_lea.hbm %s4302_s11, 1024  ;;  %s3352_s15 = scalar_lea.hbm %s4353_s5, 2048 }
 0x2cf   : > { %p3349_p13 = scmp.ne.s32.totalorder %s4302_s11, %s3348_s12  ;;  %p3353_p4 = scmp.lt.u32.totalorder %s4302_s11, %s4353_s5 }
 0x2d0   : > { %p3354_p5 = scmp.lt.u32.totalorder %s3352_s15, %s3348_s12  ;;  %p3356_p11 = scmp.lt.u32.totalorder %s3348_s12, %s4302_s11 }
 0x2d1   : > { %p3350_p6 = pnand %p3349_p13, %p4430_p0 }
 0x2d2   : > { %p3355_p8 = por %p3354_p5, %p3353_p4 }
 0x2d3   : > { %p3351_p10 = pneg %p3350_p6 }
 0x2d4   : > { %p3357_p2 = por %p3356_p11, %p3355_p8 }
 0x2d6   : > { %p3358_p3 = pnand %p3357_p2, %p3351_p10 }
 0x2d8   : > { %3361 = shalt.err (!%p3358_p3)
}
 0x2d9   : > { %s3413_s13 = smov 128   ;;  %s3414_s9 = smov 8  }
 0x2da   : > { %3178 = dma.vmem_to_hbm [thread:$0]  (%p4430_p0), %s4295_s28, 1024, %s4302_s11, %s2041_s22, %s3413_s13, %s3413_s13, %s3414_s9  }
 0x2db PF: > { %s2069_s30 = sand.u32 1, %s3392_s18   ;;  %p4431_p7 = scmp.ne.s32.totalorder %s4371_s25, 0 }
 0x2dc   : > { %p4432_p9 = scmp.ge.s32.totalorder %s3404_s21, 2  ;;  %s2070_s17 = scalar_lea.sflag [#allocation4], %s2069_s30 }
 0x2de   : > { %p3192_p12 = pnand %p4432_p9, %p4431_p7 }
 0x2e0   : > { %3387 = dma.done.wait (!%p3192_p12), %s2070_s17, 1024  }
 0x2e1   : > { %3389 = vsyncadd (!%p3192_p12), %s2070_s17, 4294966272  ;;  %p19_p1 = scmp.ge.s32.totalorder %s3561_s29, 4   ;;  %s4433_s18 = smov %s3396_s19 }
 0x2e2   : > { %s4434_s19 = smov %s3400_s20  ;;  %s4435_s20 = smov %s3577_s27 }
 0x2e3   : > { %s4436_s21 = smov %s3561_s29  ;;  %21 = sbr.rel (!%p19_p1) target bundleno = 6 (0x6), region = 93 }
 0x2ea   :  { %2075 = vsyncpa [#allocation3], 1 }
 0x2eb   :  { %2077 = vsyncpa [#allocation3 + $0x1], 1 }
 0x2ec   :  { %2078 = vsyncpa [#allocation6], 1 }
 0x2ed   :  { %2079 = vsyncpa [#allocation4], 1 }
 0x2ee   :  { %2081 = vsyncpa [#allocation4 + $0x1], 1 }

</bundles_post_ra>
